<compile_context>
chip_gen: v5e
topology: v5e:2x2
jax: 0.10.0
libtpu: 0.0.40
codegen_flags: <defaults>
</compile_context>

<pallas_src>
import functools
import math

import jax
import jax.numpy as jnp
from jax.experimental import pallas as pl
from jax.experimental.pallas import tpu as pltpu


_VMEM_LIMIT_CACHE = None


def _vmem_limit_bytes():
    """Generation-aware scoped-VMEM limit (~75% of physical, capped)."""
    global _VMEM_LIMIT_CACHE
    if _VMEM_LIMIT_CACHE is None:
        try:
            cap = pltpu.get_tpu_info().vmem_capacity_bytes
        except Exception:
            cap = 64 * 1024 * 1024
        _VMEM_LIMIT_CACHE = int(min((cap * 3) // 4, 100 * 1024 * 1024))
    return _VMEM_LIMIT_CACHE


def _fit(dim, pref):
    """Largest aligned tile <= pref that evenly divides dim (fallback: full dim)."""
    for cand in (pref, 512, 384, 256, 128):
        if cand <= pref and cand <= dim and dim % cand == 0:
            return cand
    return dim


# ---------------------------------------------------------------------------
# Generic tiled dense (+bias, +GELU), bf16 in / selectable out dtype
# ---------------------------------------------------------------------------
def _dense_kernel(x_ref, w_ref, b_ref, o_ref, acc_ref, *, activation):
    @pl.when(pl.program_id(2) == 0)
    def _init():
        acc_ref[...] = jnp.zeros_like(acc_ref)

    acc_ref[...] += jnp.dot(x_ref[...], w_ref[...],
                            preferred_element_type=jnp.float32)

    @pl.when(pl.program_id(2) == pl.num_programs(2) - 1)
    def _fin():
        y = acc_ref[...] + b_ref[...]
        if activation == "gelu":
            # TODO(synk): tanh-approx GELU instead of HF's exact erf GELU.
            y = 0.5 * y * (1.0 + jnp.tanh(
                0.7978845608028654 * (y + 0.044715 * y * y * y)))
        o_ref[...] = y.astype(o_ref.dtype)


def pallas_dense(x, w, b=None, activation=None, out_dtype=jnp.float32,
                 tm=512, tn=512, tk=512):
    M, K = x.shape
    N = w.shape[1]
    tm = _fit(M, tm)
    tn = _fit(N, tn)
    tk = _fit(K, tk)
    if b is None:
        b = jnp.zeros((N,), jnp.float32)
    x_bf = x.astype(jnp.bfloat16)                 # activation pre-cast: halves DMA
    w_bf = w.astype(jnp.bfloat16)
    kernel = functools.partial(_dense_kernel, activation=activation)
    return pl.pallas_call(
        kernel,
        out_shape=jax.ShapeDtypeStruct((M, N), out_dtype),
        grid=(M // tm, N // tn, K // tk),
        in_specs=[
            pl.BlockSpec((tm, tk), lambda i, j, k: (i, k)),
            pl.BlockSpec((tk, tn), lambda i, j, k: (k, j)),
            pl.BlockSpec((1, tn), lambda i, j, k: (0, j)),
        ],
        out_specs=pl.BlockSpec((tm, tn), lambda i, j, k: (i, j)),
        scratch_shapes=[pltpu.VMEM((tm, tn), jnp.float32)],
        compiler_params=pltpu.CompilerParams(
            dimension_semantics=("parallel", "parallel", "arbitrary"),
            vmem_limit_bytes=_vmem_limit_bytes()),
    )(x_bf, w_bf, b.astype(jnp.float32).reshape(1, N))


# ---------------------------------------------------------------------------
# Tiled dense fused with bias + residual add + LayerNorm (+ optional average)
# ---------------------------------------------------------------------------
def _dense_add_ln_kernel(x_ref, w_ref, b_ref, res_ref, g_ref, beta_ref, *rest,
                         eps, has_avg):
    if has_avg:
        avg_ref, o_ref, acc_ref = rest
    else:
        o_ref, acc_ref = rest

    @pl.when(pl.program_id(1) == 0)
    def _init():
        acc_ref[...] = jnp.zeros_like(acc_ref)

    acc_ref[...] += jnp.dot(x_ref[...], w_ref[...],
                            preferred_element_type=jnp.float32)

    @pl.when(pl.program_id(1) == pl.num_programs(1) - 1)
    def _fin():
        h = acc_ref[...] + b_ref[...] + res_ref[...]
        mu = jnp.mean(h, axis=-1, keepdims=True)
        d = h - mu
        var = jnp.mean(d * d, axis=-1, keepdims=True)
        y = d * jax.lax.rsqrt(var + eps) * g_ref[...] + beta_ref[...]
        if has_avg:
            y = 0.5 * (y + avg_ref[...])
        o_ref[...] = y.astype(o_ref.dtype)


def pallas_dense_ln(x, w, b, residual, gamma, beta, eps, avg_with=None,
                    tm=512, tk=512):
    """x (M,K) @ w (K,N) + b, then LayerNorm(out + residual) [then 0.5*(y+avg)]."""
    M, K = x.shape
    N = w.shape[1]
    tm = _fit(M, tm)
    tk = _fit(K, tk)
    x_bf = x.astype(jnp.bfloat16)
    w_bf = w.astype(jnp.bfloat16)
    has_avg = avg_with is not None
    kernel = functools.partial(_dense_add_ln_kernel, eps=eps, has_avg=has_avg)
    in_specs = [
        pl.BlockSpec((tm, tk), lambda i, k: (i, k)),
        pl.BlockSpec((tk, N), lambda i, k: (k, 0)),
        pl.BlockSpec((1, N), lambda i, k: (0, 0)),
        pl.BlockSpec((tm, N), lambda i, k: (i, 0)),
        pl.BlockSpec((1, N), lambda i, k: (0, 0)),
        pl.BlockSpec((1, N), lambda i, k: (0, 0)),
    ]
    operands = [x_bf, w_bf, b.reshape(1, N), residual,
                gamma.reshape(1, N), beta.reshape(1, N)]
    if has_avg:
        in_specs.append(pl.BlockSpec((tm, N), lambda i, k: (i, 0)))
        operands.append(avg_with)
    return pl.pallas_call(
        kernel,
        out_shape=jax.ShapeDtypeStruct((M, N), jnp.float32),
        grid=(M // tm, K // tk),
        in_specs=in_specs,
        out_specs=pl.BlockSpec((tm, N), lambda i, k: (i, 0)),
        scratch_shapes=[pltpu.VMEM((tm, N), jnp.float32)],
        compiler_params=pltpu.CompilerParams(
            dimension_semantics=("parallel", "arbitrary"),
            vmem_limit_bytes=_vmem_limit_bytes()),
    )(*operands)


# ---------------------------------------------------------------------------
# Attention-output projection: consumes (B, H, S) context (transposed layout),
# reduces the full K=H per step (full MXU depth), fuses bias+residual+LN.
# ---------------------------------------------------------------------------
def _ctx_dense_ln_kernel(x_ref, w_ref, b_ref, res_ref, g_ref, beta_ref,
                         o_ref, acc_ref, *, eps):
    @pl.when(pl.program_id(2) == 0)
    def _init():
        acc_ref[...] = jnp.zeros_like(acc_ref)

    # x block is (1, tk, ts): contract dim 0 of (tk, ts) with dim 0 of (tk, N).
    acc_ref[...] += jax.lax.dot_general(
        x_ref[0], w_ref[...], (((0,), (0,)), ((), ())),
        preferred_element_type=jnp.float32)

    @pl.when(pl.program_id(2) == pl.num_programs(2) - 1)
    def _fin():
        h = acc_ref[...] + b_ref[...] + res_ref[0]
        mu = jnp.mean(h, axis=-1, keepdims=True)
        d = h - mu
        var = jnp.mean(d * d, axis=-1, keepdims=True)
        o_ref[0] = (d * jax.lax.rsqrt(var + eps) * g_ref[...]
                    + beta_ref[...]).astype(o_ref.dtype)


def pallas_ctx_dense_ln(ctx_hs, w, b, residual3d, gamma, beta, eps,
                        ts=512, tk=512):
    B, K, S = ctx_hs.shape          # K == hidden size (heads already merged)
    N = w.shape[1]
    ts = _fit(S, ts)
    tk = _fit(K, tk)
    w_bf = w.astype(jnp.bfloat16)
    kernel = functools.partial(_ctx_dense_ln_kernel, eps=eps)
    return pl.pallas_call(
        kernel,
        out_shape=jax.ShapeDtypeStruct((B, S, N), jnp.float32),
        grid=(B, S // ts, K // tk),
        in_specs=[
            pl.BlockSpec((1, tk, ts), lambda b, si, k: (b, k, si)),
            pl.BlockSpec((tk, N), lambda b, si, k: (k, 0)),
            pl.BlockSpec((1, N), lambda b, si, k: (0, 0)),
            pl.BlockSpec((1, ts, N), lambda b, si, k: (b, si, 0)),
            pl.BlockSpec((1, N), lambda b, si, k: (0, 0)),
            pl.BlockSpec((1, N), lambda b, si, k: (0, 0)),
        ],
        out_specs=pl.BlockSpec((1, ts, N), lambda b, si, k: (b, si, 0)),
        scratch_shapes=[pltpu.VMEM((ts, N), jnp.float32)],
        compiler_params=pltpu.CompilerParams(
            dimension_semantics=("parallel", "parallel", "arbitrary"),
            vmem_limit_bytes=_vmem_limit_bytes()),
    )(ctx_hs, w_bf, b.reshape(1, N), residual3d,
      gamma.reshape(1, N), beta.reshape(1, N))


# ---------------------------------------------------------------------------
# Disentangled self-attention kernel, grid = (batch, head)
# ---------------------------------------------------------------------------
def _attn_kernel(qkv_ref, bias_ref, mask_ref, o_ref, *, head_dim, inv_scale):
    d = head_dim
    blk = qkv_ref[0, 0]                                  # (S, 3*Dh) bf16
    q = blk[:, :d]
    k = blk[:, d:2 * d]
    v = blk[:, 2 * d:3 * d]

    content = jax.lax.dot_general(                       # (S, S) f32
        q, k, (((1,), (1,)), ((), ())), preferred_element_type=jnp.float32)
    scores = (content + bias_ref[0, 0].astype(jnp.float32)) * inv_scale

    keep = mask_ref[0] > 0.0                             # (1, S) key mask
    scores = jnp.where(keep, scores, jnp.finfo(jnp.float32).min)
    mx = jnp.max(scores, axis=-1, keepdims=True)
    e = jnp.exp(scores - mx)                             # masked keys -> exactly 0
    p = e / jnp.sum(e, axis=-1, keepdims=True)

    # ctx^T = V^T @ P^T computed directly -> (Dh, S): lane-dense output block.
    ctx_t = jax.lax.dot_general(
        v, p.astype(jnp.bfloat16), (((0,), (1,)), ((), ())),
        preferred_element_type=jnp.float32)
    # XSoftmax re-mask: zero context of padded QUERY positions (= columns here).
    ctx_t = ctx_t * mask_ref[0]
    o_ref[0, 0] = ctx_t.astype(o_ref.dtype)


def pallas_attention(qkv_t, rel_bias, mask_key, head_dim, inv_scale):
    """qkv_t (B, nH, S, 3*Dh) bf16, rel_bias (B, nH, S, S) bf16,
    mask_key (B, 1, S) f32 -> context (B, nH, Dh, S) bf16."""
    B, nH, S, three_dh = qkv_t.shape
    kernel = functools.partial(_attn_kernel, head_dim=head_dim,
                               inv_scale=inv_scale)
    return pl.pallas_call(
        kernel,
        out_shape=jax.ShapeDtypeStruct((B, nH, head_dim, S), jnp.bfloat16),
        grid=(B, nH),
        in_specs=[
            pl.BlockSpec((1, 1, S, three_dh), lambda b, h: (b, h, 0, 0)),
            pl.BlockSpec((1, 1, S, S), lambda b, h: (b, h, 0, 0)),
            pl.BlockSpec((1, 1, S), lambda b, h: (b, 0, 0)),
        ],
        out_specs=pl.BlockSpec((1, 1, head_dim, S), lambda b, h: (b, h, 0, 0)),
        compiler_params=pltpu.CompilerParams(
            dimension_semantics=("parallel", "parallel"),
            vmem_limit_bytes=_vmem_limit_bytes()),
    )(qkv_t, rel_bias, mask_key)


# ---------------------------------------------------------------------------
# DeBERTa layer / encoder glue (plain JAX around the Pallas kernels)
# ---------------------------------------------------------------------------
def _fused_qkv_bias(q_bias, v_bias, nH, Dh):
    """Fold q_bias / v_bias into the fused in_proj bias using the HF
    per-head-interleaved [q_h | k_h | v_h] column layout (exact)."""
    qb = q_bias.reshape(nH, Dh)
    vb = v_bias.reshape(nH, Dh)
    return jnp.concatenate([qb, jnp.zeros_like(qb), vb],
                           axis=-1).reshape(3 * nH * Dh)


def deberta_layer_forward(x, mask_key, rel_slice, rel_idx, lp, cfg, avg_with2d):
    B, S, H = x.shape
    nH = cfg["num_heads"]
    Dh = H // nH
    D2 = rel_slice.shape[0]
    x2d = x.reshape(B * S, H)

    # Fused QKV projection (q/v biases folded in), bf16 output.
    b_qkv = _fused_qkv_bias(lp["q_bias"], lp["v_bias"], nH, Dh)
    qkv = pallas_dense(x2d, lp["w_in"], b_qkv, out_dtype=jnp.bfloat16)   # (B*S, 3H)
    # Per-head layout for the attention kernel (one bf16 transpose pass in XLA).
    qkv_t = jnp.transpose(qkv.reshape(B, S, nH, 3 * Dh), (0, 2, 1, 3))   # (B,nH,S,3Dh)

    # Relative-position projections (shared across batch elements).
    pos_k = pallas_dense(rel_slice, lp["w_pos_k"], None, out_dtype=jnp.bfloat16)
    pos_q = pallas_dense(rel_slice, lp["w_pos_q"], lp["b_pos_q"],
                         out_dtype=jnp.bfloat16)

    # Disentangled c2p/p2c bias: bf16 einsums + shared-(S,S)-index XLA gather.
    # TODO(synk): gather kept in XLA between kernels (in-kernel dynamic gather
    # lowering is not relied upon).
    q_t = qkv_t[..., :Dh]            # already includes q_bias
    k_t = qkv_t[..., Dh:2 * Dh]
    pos_k_h = pos_k.reshape(D2, nH, Dh)
    pos_q_h = pos_q.reshape(D2, nH, Dh)
    c2p = jnp.einsum("bnsd,pnd->bnsp", q_t, pos_k_h,
                     preferred_element_type=jnp.float32)                 # (B,nH,S,2span)
    p2c = jnp.einsum("bnsd,pnd->bnsp", k_t, pos_q_h,
                     preferred_element_type=jnp.float32)
    rows = jnp.arange(S)[:, None]
    bias_c2p = c2p[:, :, rows, rel_idx]                                  # q_i . pos_k[d(i,j)]
    bias_p2c = jnp.swapaxes(p2c[:, :, rows, rel_idx.T], -1, -2)          # k_j . pos_q[d(i,j)]
    rel_bias = (bias_c2p + bias_p2c).astype(jnp.bfloat16)                # (B,nH,S,S) bf16

    inv_scale = 1.0 / math.sqrt(Dh * 3.0)      # scale_factor = 1 + len({"c2p","p2c"})
    ctx = pallas_attention(qkv_t, rel_bias, mask_key, Dh, inv_scale)     # (B,nH,Dh,S)
    ctx_hs = ctx.reshape(B, H, S)                                        # free reshape

    # SelfOutput: dense (K=H, full MXU depth) + residual LayerNorm.
    attn = pallas_ctx_dense_ln(ctx_hs, lp["w_attn_o"], lp["b_attn_o"], x,
                               lp["ln1_g"], lp["ln1_b"], cfg["ln_eps"])  # (B,S,H)
    attn2d = attn.reshape(B * S, H)

    # Intermediate (GELU) + Output dense + residual LayerNorm (+ fused average).
    inter = pallas_dense(attn2d, lp["w_inter"], lp["b_inter"], activation="gelu",
                         out_dtype=jnp.bfloat16)
    y2d = pallas_dense_ln(inter, lp["w_out"], lp["b_out"], attn2d,
                          lp["ln2_g"], lp["ln2_b"], cfg["ln_eps"],
                          avg_with=avg_with2d)
    return y2d.reshape(B, S, H)


def deberta_encoder_forward(hidden_states, attention_mask, params, cfg):
    B, S, H = hidden_states.shape

    # get_attention_mask: only the 1-D key mask is shipped; the (S,S) pair
    # mask of the reference is reproduced inside the attention kernel via
    # key-side pre-softmax fill + query-side post-softmax zeroing.
    mask_key = attention_mask.astype(jnp.float32).reshape(B, 1, S)

    # get_rel_pos / rel embedding slice + clamped relative-position indices.
    max_rel = cfg["max_relative_positions"]
    span = min(S, max_rel)
    rel_slice = params["rel_embeddings"][max_rel - span:max_rel + span]  # (2span, H)
    i_ids = jnp.arange(S)[:, None]
    j_ids = jnp.arange(S)[None, :]
    rel_idx = jnp.clip(i_ids - j_ids + span, 0, 2 * span - 1).astype(jnp.int32)

    next_kv = hidden_states
    last = None
    for li, lp in enumerate(params["layers"]):
        if li % 6 == 0:
            h = deberta_layer_forward(next_kv, mask_key, rel_slice, rel_idx,
                                      lp, cfg, None)
            last = h
        else:
            # (h + last)/2 fused into the final dense+LN epilogue of the layer.
            h = deberta_layer_forward(next_kv, mask_key, rel_slice, rel_idx,
                                      lp, cfg, last.reshape(B * S, H))
        next_kv = h
    return next_kv


# ---------------------------------------------------------------------------
# Deterministic parameter initialization (synthetic, no checkpoint load).
# w_in uses the HF per-head-interleaved [q_h | k_h | v_h] column layout.
# ---------------------------------------------------------------------------
def init_params(key, cfg):
    H = cfg["hidden"]
    I = cfg["intermediate"]
    L = cfg["num_layers"]
    max_rel = cfg["max_relative_positions"]

    def nrm(k, shape):
        return 0.02 * jax.random.normal(k, shape, jnp.float32)

    keys = jax.random.split(key, L + 1)
    params = {"rel_embeddings": nrm(keys[0], (2 * max_rel, H)), "layers": []}
    for l in range(L):
        ks = jax.random.split(keys[l + 1], 6)
        params["layers"].append({
            "w_in": nrm(ks[0], (H, 3 * H)),
            "q_bias": jnp.zeros((H,), jnp.float32),
            "v_bias": jnp.zeros((H,), jnp.float32),
            "w_pos_k": nrm(ks[1], (H, H)),
            "w_pos_q": nrm(ks[2], (H, H)),
            "b_pos_q": jnp.zeros((H,), jnp.float32),
            "w_attn_o": nrm(ks[3], (H, H)),
            "b_attn_o": jnp.zeros((H,), jnp.float32),
            "ln1_g": jnp.ones((H,), jnp.float32),
            "ln1_b": jnp.zeros((H,), jnp.float32),
            "w_inter": nrm(ks[4], (H, I)),
            "b_inter": jnp.zeros((I,), jnp.float32),
            "w_out": nrm(ks[5], (I, H)),
            "b_out": jnp.zeros((H,), jnp.float32),
            "ln2_g": jnp.ones((H,), jnp.float32),
            "ln2_b": jnp.zeros((H,), jnp.float32),
        })
    return params


# ---------------------------------------------------------------------------
if __name__ == "__main__":
    cfg = dict(
        hidden=32,
        num_heads=4,
        intermediate=64,
        num_layers=2,
        max_relative_positions=16,   # relative_attention=True
        ln_eps=1e-7,
    )
    B, S = 2, 8

    key = jax.random.PRNGKey(0)
    k_hid, k_par = jax.random.split(key)
    hidden_states = jax.random.normal(k_hid, (B, S, cfg["hidden"]), jnp.float32)
    attention_mask = jnp.ones((B, S), jnp.int32).at[1, 6:].set(0)  # pad 2 tokens of seq 1

    params = init_params(k_par, cfg)

    @jax.jit
    def run(h, m, p):
        return deberta_encoder_forward(h, m, p, cfg)

    out = run(hidden_states, attention_mask, params)
    out = jax.block_until_ready(out)

    assert out.shape == (B, S, cfg["hidden"])
    assert bool(jnp.all(jnp.isfinite(out)))
    print("KERNEL_OK")
</pallas_src>

<mosaic_0001>
module attributes {stable_mosaic.version = 11 : i64} {
  func.func @_dense_kernel(%arg0: i32, %arg1: i32, %arg2: i32, %arg3: memref<16x32xbf16, #tpu.memory_space<vmem>>, %arg4: memref<32x32xbf16, #tpu.memory_space<vmem>>, %arg5: memref<1x32xf32, #tpu.memory_space<vmem>>, %arg6: memref<16x32xbf16, #tpu.memory_space<vmem>>, %arg7: memref<16x32xf32, #tpu.memory_space<vmem>>) attributes {dimension_semantics = [#tpu.dimension_semantics<parallel>, #tpu.dimension_semantics<parallel>, #tpu.dimension_semantics<arbitrary>], iteration_bounds = array<i64: 1, 1, 1>, scalar_prefetch = 0 : i64, scratch_operands = 1 : i64, tpu.core_type = #tpu.core_type<tc>, window_params = [{transform_indices = @transform_0, window_bounds = array<i64: 16, 32>}, {transform_indices = @transform_1, window_bounds = array<i64: 32, 32>}, {transform_indices = @transform_2, window_bounds = array<i64: 1, 32>}, {transform_indices = @transform_3, window_bounds = array<i64: 16, 32>}]} {
    %c0_i32 = arith.constant 0 : i32
    %0 = arith.cmpi eq, %arg2, %c0_i32 : i32
    %1 = arith.extui %0 : i1 to i32
    %c0_i32_0 = arith.constant 0 : i32
    %2 = arith.cmpi ne, %1, %c0_i32_0 : i32
    scf.if %2 {
      %cst_10 = arith.constant 0.000000e+00 : f32
      %12 = vector.broadcast %cst_10 : f32 to vector<16x32xf32>
      %c0_11 = arith.constant 0 : index
      %c0_12 = arith.constant 0 : index
      %13 = vector.load %arg7[%c0_11, %c0_12] : memref<16x32xf32, #tpu.memory_space<vmem>>, vector<16x32xf32>
      tpu.vector_store %arg7[%c0_11, %c0_12], %12 {strides = array<i32>} : memref<16x32xf32, #tpu.memory_space<vmem>>, vector<16x32xf32>,
    } else {
    }
    %c0 = arith.constant 0 : index
    %c0_1 = arith.constant 0 : index
    %3 = vector.load %arg7[%c0, %c0_1] : memref<16x32xf32, #tpu.memory_space<vmem>>, vector<16x32xf32>
    %c0_2 = arith.constant 0 : index
    %c0_3 = arith.constant 0 : index
    %4 = vector.load %arg3[%c0_2, %c0_3] : memref<16x32xbf16, #tpu.memory_space<vmem>>, vector<16x32xbf16>
    %c0_4 = arith.constant 0 : index
    %c0_5 = arith.constant 0 : index
    %5 = vector.load %arg4[%c0_4, %c0_5] : memref<32x32xbf16, #tpu.memory_space<vmem>>, vector<32x32xbf16>
    %cst = arith.constant dense<0.000000e+00> : vector<16x32xf32>
    %6 = tpu.matmul %4, %5, %cst {dimension_numbers = #tpu.dot_dimension_numbers<[1], [0], [0], [1], [0, 0, 1, 1], [], []>} : vector<16x32xbf16>, vector<32x32xbf16>, vector<16x32xf32> -> vector<16x32xf32>
    %7 = arith.addf %3, %6 : vector<16x32xf32>
    %c0_6 = arith.constant 0 : index
    %c0_7 = arith.constant 0 : index
    %8 = vector.load %arg7[%c0_6, %c0_7] : memref<16x32xf32, #tpu.memory_space<vmem>>, vector<16x32xf32>
    tpu.vector_store %arg7[%c0_6, %c0_7], %7 {strides = array<i32>} : memref<16x32xf32, #tpu.memory_space<vmem>>, vector<16x32xf32>,
    %c0_i32_8 = arith.constant 0 : i32
    %9 = arith.cmpi eq, %arg2, %c0_i32_8 : i32
    %10 = arith.extui %9 : i1 to i32
    %c0_i32_9 = arith.constant 0 : i32
    %11 = arith.cmpi ne, %10, %c0_i32_9 : i32
    scf.if %11 {
      %c0_10 = arith.constant 0 : index
      %c0_11 = arith.constant 0 : index
      %12 = vector.load %arg7[%c0_10, %c0_11] : memref<16x32xf32, #tpu.memory_space<vmem>>, vector<16x32xf32>
      %c0_12 = arith.constant 0 : index
      %c0_13 = arith.constant 0 : index
      %13 = vector.load %arg5[%c0_12, %c0_13] : memref<1x32xf32, #tpu.memory_space<vmem>>, vector<1x32xf32>
      %14 = vector.broadcast %13 : vector<1x32xf32> to vector<16x32xf32>
      %15 = arith.addf %12, %14 : vector<16x32xf32>
      %16 = arith.truncf %15 : vector<16x32xf32> to vector<16x32xbf16>
      %c0_14 = arith.constant 0 : index
      %c0_15 = arith.constant 0 : index
      %17 = vector.load %arg6[%c0_14, %c0_15] : memref<16x32xbf16, #tpu.memory_space<vmem>>, vector<16x32xbf16>
      tpu.vector_store %arg6[%c0_14, %c0_15], %16 {strides = array<i32>} : memref<16x32xbf16, #tpu.memory_space<vmem>>, vector<16x32xbf16>,
    } else {
    }
    return
  }
  func.func @transform_0(%arg0: i32, %arg1: i32, %arg2: i32) -> (i32, i32) {
    %c0_i32 = arith.constant 0 : i32
    return %arg0, %arg2 : i32, i32
  }
  func.func @transform_1(%arg0: i32, %arg1: i32, %arg2: i32) -> (i32, i32) {
    %c0_i32 = arith.constant 0 : i32
    return %arg2, %arg1 : i32, i32
  }
  func.func @transform_2(%arg0: i32, %arg1: i32, %arg2: i32) -> (i32, i32) {
    %c0_i32 = arith.constant 0 : i32
    %c0_i32_0 = arith.constant 0 : i32
    return %c0_i32, %arg1 : i32, i32
  }
  func.func @transform_3(%arg0: i32, %arg1: i32, %arg2: i32) -> (i32, i32) {
    %c0_i32 = arith.constant 0 : i32
    return %arg0, %arg1 : i32, i32
  }
}

module attributes {stable_mosaic.version = 11 : i64} {
  func.func @_dense_kernel(%arg0: i32, %arg1: i32, %arg2: i32, %arg3: memref<16x32xbf16, #tpu.memory_space<vmem>>, %arg4: memref<32x96xbf16, #tpu.memory_space<vmem>>, %arg5: memref<1x96xf32, #tpu.memory_space<vmem>>, %arg6: memref<16x96xbf16, #tpu.memory_space<vmem>>, %arg7: memref<16x96xf32, #tpu.memory_space<vmem>>) attributes {dimension_semantics = [#tpu.dimension_semantics<parallel>, #tpu.dimension_semantics<parallel>, #tpu.dimension_semantics<arbitrary>], iteration_bounds = array<i64: 1, 1, 1>, scalar_prefetch = 0 : i64, scratch_operands = 1 : i64, tpu.core_type = #tpu.core_type<tc>, window_params = [{transform_indices = @transform_0, window_bounds = array<i64: 16, 32>}, {transform_indices = @transform_1, window_bounds = array<i64: 32, 96>}, {transform_indices = @transform_2, window_bounds = array<i64: 1, 96>}, {transform_indices = @transform_3, window_bounds = array<i64: 16, 96>}]} {
    %c0_i32 = arith.constant 0 : i32
    %0 = arith.cmpi eq, %arg2, %c0_i32 : i32
    %1 = arith.extui %0 : i1 to i32
    %c0_i32_0 = arith.constant 0 : i32
    %2 = arith.cmpi ne, %1, %c0_i32_0 : i32
    scf.if %2 {
      %cst_10 = arith.constant 0.000000e+00 : f32
      %12 = vector.broadcast %cst_10 : f32 to vector<16x96xf32>
      %c0_11 = arith.constant 0 : index
      %c0_12 = arith.constant 0 : index
      %13 = vector.load %arg7[%c0_11, %c0_12] : memref<16x96xf32, #tpu.memory_space<vmem>>, vector<16x96xf32>
      tpu.vector_store %arg7[%c0_11, %c0_12], %12 {strides = array<i32>} : memref<16x96xf32, #tpu.memory_space<vmem>>, vector<16x96xf32>,
    } else {
    }
    %c0 = arith.constant 0 : index
    %c0_1 = arith.constant 0 : index
    %3 = vector.load %arg7[%c0, %c0_1] : memref<16x96xf32, #tpu.memory_space<vmem>>, vector<16x96xf32>
    %c0_2 = arith.constant 0 : index
    %c0_3 = arith.constant 0 : index
    %4 = vector.load %arg3[%c0_2, %c0_3] : memref<16x32xbf16, #tpu.memory_space<vmem>>, vector<16x32xbf16>
    %c0_4 = arith.constant 0 : index
    %c0_5 = arith.constant 0 : index
    %5 = vector.load %arg4[%c0_4, %c0_5] : memref<32x96xbf16, #tpu.memory_space<vmem>>, vector<32x96xbf16>
    %cst = arith.constant dense<0.000000e+00> : vector<16x96xf32>
    %6 = tpu.matmul %4, %5, %cst {dimension_numbers = #tpu.dot_dimension_numbers<[1], [0], [0], [1], [0, 0, 1, 1], [], []>} : vector<16x32xbf16>, vector<32x96xbf16>, vector<16x96xf32> -> vector<16x96xf32>
    %7 = arith.addf %3, %6 : vector<16x96xf32>
    %c0_6 = arith.constant 0 : index
    %c0_7 = arith.constant 0 : index
    %8 = vector.load %arg7[%c0_6, %c0_7] : memref<16x96xf32, #tpu.memory_space<vmem>>, vector<16x96xf32>
    tpu.vector_store %arg7[%c0_6, %c0_7], %7 {strides = array<i32>} : memref<16x96xf32, #tpu.memory_space<vmem>>, vector<16x96xf32>,
    %c0_i32_8 = arith.constant 0 : i32
    %9 = arith.cmpi eq, %arg2, %c0_i32_8 : i32
    %10 = arith.extui %9 : i1 to i32
    %c0_i32_9 = arith.constant 0 : i32
    %11 = arith.cmpi ne, %10, %c0_i32_9 : i32
    scf.if %11 {
      %c0_10 = arith.constant 0 : index
      %c0_11 = arith.constant 0 : index
      %12 = vector.load %arg7[%c0_10, %c0_11] : memref<16x96xf32, #tpu.memory_space<vmem>>, vector<16x96xf32>
      %c0_12 = arith.constant 0 : index
      %c0_13 = arith.constant 0 : index
      %13 = vector.load %arg5[%c0_12, %c0_13] : memref<1x96xf32, #tpu.memory_space<vmem>>, vector<1x96xf32>
      %14 = vector.broadcast %13 : vector<1x96xf32> to vector<16x96xf32>
      %15 = arith.addf %12, %14 : vector<16x96xf32>
      %16 = arith.truncf %15 : vector<16x96xf32> to vector<16x96xbf16>
      %c0_14 = arith.constant 0 : index
      %c0_15 = arith.constant 0 : index
      %17 = vector.load %arg6[%c0_14, %c0_15] : memref<16x96xbf16, #tpu.memory_space<vmem>>, vector<16x96xbf16>
      tpu.vector_store %arg6[%c0_14, %c0_15], %16 {strides = array<i32>} : memref<16x96xbf16, #tpu.memory_space<vmem>>, vector<16x96xbf16>,
    } else {
    }
    return
  }
  func.func @transform_0(%arg0: i32, %arg1: i32, %arg2: i32) -> (i32, i32) {
    %c0_i32 = arith.constant 0 : i32
    return %arg0, %arg2 : i32, i32
  }
  func.func @transform_1(%arg0: i32, %arg1: i32, %arg2: i32) -> (i32, i32) {
    %c0_i32 = arith.constant 0 : i32
    return %arg2, %arg1 : i32, i32
  }
  func.func @transform_2(%arg0: i32, %arg1: i32, %arg2: i32) -> (i32, i32) {
    %c0_i32 = arith.constant 0 : i32
    %c0_i32_0 = arith.constant 0 : i32
    return %c0_i32, %arg1 : i32, i32
  }
  func.func @transform_3(%arg0: i32, %arg1: i32, %arg2: i32) -> (i32, i32) {
    %c0_i32 = arith.constant 0 : i32
    return %arg0, %arg1 : i32, i32
  }
}

module attributes {stable_mosaic.version = 11 : i64} {
  func.func @_attn_kernel(%arg0: i32, %arg1: i32, %arg2: memref<1x1x8x24xbf16, #tpu.memory_space<vmem>>, %arg3: memref<1x1x8x8xbf16, #tpu.memory_space<vmem>>, %arg4: memref<1x1x8xf32, #tpu.memory_space<vmem>>, %arg5: memref<1x1x8x8xbf16, #tpu.memory_space<vmem>>) attributes {dimension_semantics = [#tpu.dimension_semantics<parallel>, #tpu.dimension_semantics<parallel>], iteration_bounds = array<i64: 2, 4>, scalar_prefetch = 0 : i64, scratch_operands = 0 : i64, tpu.core_type = #tpu.core_type<tc>, window_params = [{transform_indices = @transform_0, window_bounds = array<i64: 1, 1, 8, 24>}, {transform_indices = @transform_1, window_bounds = array<i64: 1, 1, 8, 8>}, {transform_indices = @transform_2, window_bounds = array<i64: 1, 1, 8>}, {transform_indices = @transform_3, window_bounds = array<i64: 1, 1, 8, 8>}]} {
    %c0 = arith.constant 0 : index
    %c0_0 = arith.constant 0 : index
    %c0_1 = arith.constant 0 : index
    %c0_2 = arith.constant 0 : index
    %0 = vector.load %arg2[%c0, %c0_0, %c0_1, %c0_2] : memref<1x1x8x24xbf16, #tpu.memory_space<vmem>>, vector<1x1x8x24xbf16>
    %1 = vector.shape_cast %0 : vector<1x1x8x24xbf16> to vector<8x24xbf16>
    %2 = vector.extract_strided_slice %1 {offsets = [0, 0], sizes = [8, 8], strides = [1, 1]} : vector<8x24xbf16> to vector<8x8xbf16>
    %3 = vector.extract_strided_slice %1 {offsets = [0, 8], sizes = [8, 8], strides = [1, 1]} : vector<8x24xbf16> to vector<8x8xbf16>
    %4 = vector.extract_strided_slice %1 {offsets = [0, 16], sizes = [8, 8], strides = [1, 1]} : vector<8x24xbf16> to vector<8x8xbf16>
    %cst = arith.constant dense<0.000000e+00> : vector<8x8xf32>
    %5 = tpu.matmul %2, %3, %cst {dimension_numbers = #tpu.dot_dimension_numbers<[1], [1], [0], [0], [0, 0, 1, 0], [], []>} : vector<8x8xbf16>, vector<8x8xbf16>, vector<8x8xf32> -> vector<8x8xf32>
    %c0_3 = arith.constant 0 : index
    %c0_4 = arith.constant 0 : index
    %c0_5 = arith.constant 0 : index
    %c0_6 = arith.constant 0 : index
    %6 = vector.load %arg3[%c0_3, %c0_4, %c0_5, %c0_6] : memref<1x1x8x8xbf16, #tpu.memory_space<vmem>>, vector<1x1x8x8xbf16>
    %7 = vector.shape_cast %6 : vector<1x1x8x8xbf16> to vector<8x8xbf16>
    %8 = arith.extf %7 : vector<8x8xbf16> to vector<8x8xf32>
    %9 = arith.addf %5, %8 : vector<8x8xf32>
    %cst_7 = arith.constant 0.204124153 : f32
    %10 = vector.broadcast %cst_7 : f32 to vector<8x8xf32>
    %11 = arith.mulf %9, %10 : vector<8x8xf32>
    %c0_8 = arith.constant 0 : index
    %c0_9 = arith.constant 0 : index
    %c0_10 = arith.constant 0 : index
    %12 = vector.load %arg4[%c0_8, %c0_9, %c0_10] : memref<1x1x8xf32, #tpu.memory_space<vmem>>, vector<1x1x8xf32>
    %13 = vector.shape_cast %12 : vector<1x1x8xf32> to vector<1x8xf32>
    %cst_11 = arith.constant 0.000000e+00 : f32
    %14 = vector.broadcast %cst_11 : f32 to vector<1x8xf32>
    %15 = arith.cmpf ogt, %13, %14 : vector<1x8xf32>
    %cst_12 = arith.constant -3.40282347E+38 : f32
    %16 = vector.shape_cast %15 : vector<1x8xi1> to vector<1x8xi1>
    %17 = vector.broadcast %16 : vector<1x8xi1> to vector<8x8xi1>
    %18 = vector.broadcast %cst_12 : f32 to vector<8x8xf32>
    %19 = arith.select %17, %11, %18 : vector<8x8xi1>, vector<8x8xf32>
    %cst_13 = arith.constant dense<0xFF800000> : vector<8xf32>
    %20 = vector.multi_reduction <maximumf>, %19, %cst_13 [1] : vector<8x8xf32> to vector<8xf32>
    %21 = vector.shape_cast %20 : vector<8xf32> to vector<8x1xf32>
    %22 = vector.broadcast %21 : vector<8x1xf32> to vector<8x8xf32>
    %23 = arith.subf %19, %22 : vector<8x8xf32>
    %24 = math.exp %23 : vector<8x8xf32>
    %cst_14 = arith.constant dense<0.000000e+00> : vector<8xf32>
    %25 = vector.multi_reduction <add>, %24, %cst_14 [1] : vector<8x8xf32> to vector<8xf32>
    %26 = vector.shape_cast %25 : vector<8xf32> to vector<8x1xf32>
    %27 = vector.broadcast %26 : vector<8x1xf32> to vector<8x8xf32>
    %28 = arith.divf %24, %27 : vector<8x8xf32>
    %29 = arith.truncf %28 : vector<8x8xf32> to vector<8x8xbf16>
    %cst_15 = arith.constant dense<0.000000e+00> : vector<8x8xf32>
    %30 = tpu.matmul %4, %29, %cst_15 {dimension_numbers = #tpu.dot_dimension_numbers<[0], [1], [1], [0], [0, 1, 1, 0], [], []>} : vector<8x8xbf16>, vector<8x8xbf16>, vector<8x8xf32> -> vector<8x8xf32>
    %c0_16 = arith.constant 0 : index
    %c0_17 = arith.constant 0 : index
    %c0_18 = arith.constant 0 : index
    %31 = vector.load %arg4[%c0_16, %c0_17, %c0_18] : memref<1x1x8xf32, #tpu.memory_space<vmem>>, vector<1x1x8xf32>
    %32 = vector.shape_cast %31 : vector<1x1x8xf32> to vector<1x8xf32>
    %33 = vector.broadcast %32 : vector<1x8xf32> to vector<8x8xf32>
    %34 = arith.mulf %30, %33 : vector<8x8xf32>
    %35 = arith.truncf %34 : vector<8x8xf32> to vector<8x8xbf16>
    %c0_19 = arith.constant 0 : index
    %c0_20 = arith.constant 0 : index
    %c0_21 = arith.constant 0 : index
    %c0_22 = arith.constant 0 : index
    %36 = vector.load %arg5[%c0_19, %c0_20, %c0_21, %c0_22] : memref<1x1x8x8xbf16, #tpu.memory_space<vmem>>, vector<1x1x8x8xbf16>
    %37 = vector.shape_cast %36 : vector<1x1x8x8xbf16> to vector<8x8xbf16>
    %38 = vector.shape_cast %35 : vector<8x8xbf16> to vector<1x1x8x8xbf16>
    tpu.vector_store %arg5[%c0_19, %c0_20, %c0_21, %c0_22], %38 {strides = array<i32>} : memref<1x1x8x8xbf16, #tpu.memory_space<vmem>>, vector<1x1x8x8xbf16>,
    return
  }
  func.func @transform_0(%arg0: i32, %arg1: i32) -> (i32, i32, i32, i32) {
    %c0_i32 = arith.constant 0 : i32
    %c0_i32_0 = arith.constant 0 : i32
    %c0_i32_1 = arith.constant 0 : i32
    return %arg0, %arg1, %c0_i32, %c0_i32_0 : i32, i32, i32, i32
  }
  func.func @transform_1(%arg0: i32, %arg1: i32) -> (i32, i32, i32, i32) {
    %c0_i32 = arith.constant 0 : i32
    %c0_i32_0 = arith.constant 0 : i32
    %c0_i32_1 = arith.constant 0 : i32
    return %arg0, %arg1, %c0_i32, %c0_i32_0 : i32, i32, i32, i32
  }
  func.func @transform_2(%arg0: i32, %arg1: i32) -> (i32, i32, i32) {
    %c0_i32 = arith.constant 0 : i32
    %c0_i32_0 = arith.constant 0 : i32
    %c0_i32_1 = arith.constant 0 : i32
    return %arg0, %c0_i32, %c0_i32_0 : i32, i32, i32
  }
  func.func @transform_3(%arg0: i32, %arg1: i32) -> (i32, i32, i32, i32) {
    %c0_i32 = arith.constant 0 : i32
    %c0_i32_0 = arith.constant 0 : i32
    %c0_i32_1 = arith.constant 0 : i32
    return %arg0, %arg1, %c0_i32, %c0_i32_0 : i32, i32, i32, i32
  }
}

module attributes {stable_mosaic.version = 11 : i64} {
  func.func @_ctx_dense_ln_kernel(%arg0: i32, %arg1: i32, %arg2: i32, %arg3: memref<1x32x8xbf16, #tpu.memory_space<vmem>>, %arg4: memref<32x32xbf16, #tpu.memory_space<vmem>>, %arg5: memref<1x32xf32, #tpu.memory_space<vmem>>, %arg6: memref<1x8x32xf32, #tpu.memory_space<vmem>>, %arg7: memref<1x32xf32, #tpu.memory_space<vmem>>, %arg8: memref<1x32xf32, #tpu.memory_space<vmem>>, %arg9: memref<1x8x32xf32, #tpu.memory_space<vmem>>, %arg10: memref<8x32xf32, #tpu.memory_space<vmem>>) attributes {dimension_semantics = [#tpu.dimension_semantics<parallel>, #tpu.dimension_semantics<parallel>, #tpu.dimension_semantics<arbitrary>], iteration_bounds = array<i64: 2, 1, 1>, scalar_prefetch = 0 : i64, scratch_operands = 1 : i64, tpu.core_type = #tpu.core_type<tc>, window_params = [{transform_indices = @transform_0, window_bounds = array<i64: 1, 32, 8>}, {transform_indices = @transform_1, window_bounds = array<i64: 32, 32>}, {pipeline_mode = #tpu.pipeline_mode<synchronous>, transform_indices = @transform_2, window_bounds = array<i64: 1, 32>}, {transform_indices = @transform_3, window_bounds = array<i64: 1, 8, 32>}, {pipeline_mode = #tpu.pipeline_mode<synchronous>, transform_indices = @transform_4, window_bounds = array<i64: 1, 32>}, {pipeline_mode = #tpu.pipeline_mode<synchronous>, transform_indices = @transform_5, window_bounds = array<i64: 1, 32>}, {transform_indices = @transform_6, window_bounds = array<i64: 1, 8, 32>}]} {
    %c0_i32 = arith.constant 0 : i32
    %0 = arith.cmpi eq, %arg2, %c0_i32 : i32
    %1 = arith.extui %0 : i1 to i32
    %c0_i32_0 = arith.constant 0 : i32
    %2 = arith.cmpi ne, %1, %c0_i32_0 : i32
    scf.if %2 {
      %cst_11 = arith.constant 0.000000e+00 : f32
      %13 = vector.broadcast %cst_11 : f32 to vector<8x32xf32>
      %c0_12 = arith.constant 0 : index
      %c0_13 = arith.constant 0 : index
      %14 = vector.load %arg10[%c0_12, %c0_13] : memref<8x32xf32, #tpu.memory_space<vmem>>, vector<8x32xf32>
      tpu.vector_store %arg10[%c0_12, %c0_13], %13 {strides = array<i32>} : memref<8x32xf32, #tpu.memory_space<vmem>>, vector<8x32xf32>,
    } else {
    }
    %c0 = arith.constant 0 : index
    %c0_1 = arith.constant 0 : index
    %3 = vector.load %arg10[%c0, %c0_1] : memref<8x32xf32, #tpu.memory_space<vmem>>, vector<8x32xf32>
    %c0_2 = arith.constant 0 : index
    %c0_3 = arith.constant 0 : index
    %c0_4 = arith.constant 0 : index
    %4 = vector.load %arg3[%c0_2, %c0_3, %c0_4] : memref<1x32x8xbf16, #tpu.memory_space<vmem>>, vector<1x32x8xbf16>
    %5 = vector.shape_cast %4 : vector<1x32x8xbf16> to vector<32x8xbf16>
    %c0_5 = arith.constant 0 : index
    %c0_6 = arith.constant 0 : index
    %6 = vector.load %arg4[%c0_5, %c0_6] : memref<32x32xbf16, #tpu.memory_space<vmem>>, vector<32x32xbf16>
    %cst = arith.constant dense<0.000000e+00> : vector<8x32xf32>
    %7 = tpu.matmul %5, %6, %cst {dimension_numbers = #tpu.dot_dimension_numbers<[0], [0], [1], [1], [0, 1, 1, 1], [], []>} : vector<32x8xbf16>, vector<32x32xbf16>, vector<8x32xf32> -> vector<8x32xf32>
    %8 = arith.addf %3, %7 : vector<8x32xf32>
    %c0_7 = arith.constant 0 : index
    %c0_8 = arith.constant 0 : index
    %9 = vector.load %arg10[%c0_7, %c0_8] : memref<8x32xf32, #tpu.memory_space<vmem>>, vector<8x32xf32>
    tpu.vector_store %arg10[%c0_7, %c0_8], %8 {strides = array<i32>} : memref<8x32xf32, #tpu.memory_space<vmem>>, vector<8x32xf32>,
    %c0_i32_9 = arith.constant 0 : i32
    %10 = arith.cmpi eq, %arg2, %c0_i32_9 : i32
    %11 = arith.extui %10 : i1 to i32
    %c0_i32_10 = arith.constant 0 : i32
    %12 = arith.cmpi ne, %11, %c0_i32_10 : i32
    scf.if %12 {
      %c0_11 = arith.constant 0 : index
      %c0_12 = arith.constant 0 : index
      %13 = vector.load %arg10[%c0_11, %c0_12] : memref<8x32xf32, #tpu.memory_space<vmem>>, vector<8x32xf32>
      %c0_13 = arith.constant 0 : index
      %c0_14 = arith.constant 0 : index
      %14 = vector.load %arg5[%c0_13, %c0_14] : memref<1x32xf32, #tpu.memory_space<vmem>>, vector<1x32xf32>
      %15 = vector.broadcast %14 : vector<1x32xf32> to vector<8x32xf32>
      %16 = arith.addf %13, %15 : vector<8x32xf32>
      %c0_15 = arith.constant 0 : index
      %c0_16 = arith.constant 0 : index
      %c0_17 = arith.constant 0 : index
      %17 = vector.load %arg6[%c0_15, %c0_16, %c0_17] : memref<1x8x32xf32, #tpu.memory_space<vmem>>, vector<1x8x32xf32>
      %18 = vector.shape_cast %17 : vector<1x8x32xf32> to vector<8x32xf32>
      %19 = arith.addf %16, %18 : vector<8x32xf32>
      %cst_18 = arith.constant dense<0.000000e+00> : vector<8xf32>
      %20 = vector.multi_reduction <add>, %19, %cst_18 [1] : vector<8x32xf32> to vector<8xf32>
      %21 = vector.shape_cast %20 : vector<8xf32> to vector<8x1xf32>
      %cst_19 = arith.constant 3.200000e+01 : f32
      %22 = vector.broadcast %cst_19 : f32 to vector<8x1xf32>
      %23 = arith.divf %21, %22 : vector<8x1xf32>
      %24 = vector.broadcast %23 : vector<8x1xf32> to vector<8x32xf32>
      %25 = arith.subf %19, %24 : vector<8x32xf32>
      %26 = arith.mulf %25, %25 : vector<8x32xf32>
      %cst_20 = arith.constant dense<0.000000e+00> : vector<8xf32>
      %27 = vector.multi_reduction <add>, %26, %cst_20 [1] : vector<8x32xf32> to vector<8xf32>
      %28 = vector.shape_cast %27 : vector<8xf32> to vector<8x1xf32>
      %cst_21 = arith.constant 3.200000e+01 : f32
      %29 = vector.broadcast %cst_21 : f32 to vector<8x1xf32>
      %30 = arith.divf %28, %29 : vector<8x1xf32>
      %cst_22 = arith.constant 1.000000e-07 : f32
      %31 = vector.broadcast %cst_22 : f32 to vector<8x1xf32>
      %32 = arith.addf %30, %31 : vector<8x1xf32>
      %33 = math.rsqrt %32 : vector<8x1xf32>
      %34 = vector.broadcast %33 : vector<8x1xf32> to vector<8x32xf32>
      %35 = arith.mulf %25, %34 : vector<8x32xf32>
      %c0_23 = arith.constant 0 : index
      %c0_24 = arith.constant 0 : index
      %36 = vector.load %arg7[%c0_23, %c0_24] : memref<1x32xf32, #tpu.memory_space<vmem>>, vector<1x32xf32>
      %37 = vector.broadcast %36 : vector<1x32xf32> to vector<8x32xf32>
      %38 = arith.mulf %35, %37 : vector<8x32xf32>
      %c0_25 = arith.constant 0 : index
      %c0_26 = arith.constant 0 : index
      %39 = vector.load %arg8[%c0_25, %c0_26] : memref<1x32xf32, #tpu.memory_space<vmem>>, vector<1x32xf32>
      %40 = vector.broadcast %39 : vector<1x32xf32> to vector<8x32xf32>
      %41 = arith.addf %38, %40 : vector<8x32xf32>
      %c0_27 = arith.constant 0 : index
      %c0_28 = arith.constant 0 : index
      %c0_29 = arith.constant 0 : index
      %42 = vector.load %arg9[%c0_27, %c0_28, %c0_29] : memref<1x8x32xf32, #tpu.memory_space<vmem>>, vector<1x8x32xf32>
      %43 = vector.shape_cast %42 : vector<1x8x32xf32> to vector<8x32xf32>
      %44 = vector.shape_cast %41 : vector<8x32xf32> to vector<1x8x32xf32>
      tpu.vector_store %arg9[%c0_27, %c0_28, %c0_29], %44 {strides = array<i32>} : memref<1x8x32xf32, #tpu.memory_space<vmem>>, vector<1x8x32xf32>,
    } else {
    }
    return
  }
  func.func @transform_0(%arg0: i32, %arg1: i32, %arg2: i32) -> (i32, i32, i32) {
    %c0_i32 = arith.constant 0 : i32
    return %arg0, %arg2, %arg1 : i32, i32, i32
  }
  func.func @transform_1(%arg0: i32, %arg1: i32, %arg2: i32) -> (i32, i32) {
    %c0_i32 = arith.constant 0 : i32
    %c0_i32_0 = arith.constant 0 : i32
    return %arg2, %c0_i32 : i32, i32
  }
  func.func @transform_2(%arg0: i32, %arg1: i32, %arg2: i32) -> (i32, i32) {
    %c0_i32 = arith.constant 0 : i32
    %c0_i32_0 = arith.constant 0 : i32
    %c0_i32_1 = arith.constant 0 : i32
    return %c0_i32, %c0_i32_0 : i32, i32
  }
  func.func @transform_3(%arg0: i32, %arg1: i32, %arg2: i32) -> (i32, i32, i32) {
    %c0_i32 = arith.constant 0 : i32
    %c0_i32_0 = arith.constant 0 : i32
    return %arg0, %arg1, %c0_i32 : i32, i32, i32
  }
  func.func @transform_4(%arg0: i32, %arg1: i32, %arg2: i32) -> (i32, i32) {
    %c0_i32 = arith.constant 0 : i32
    %c0_i32_0 = arith.constant 0 : i32
    %c0_i32_1 = arith.constant 0 : i32
    return %c0_i32, %c0_i32_0 : i32, i32
  }
  func.func @transform_5(%arg0: i32, %arg1: i32, %arg2: i32) -> (i32, i32) {
    %c0_i32 = arith.constant 0 : i32
    %c0_i32_0 = arith.constant 0 : i32
    %c0_i32_1 = arith.constant 0 : i32
    return %c0_i32, %c0_i32_0 : i32, i32
  }
  func.func @transform_6(%arg0: i32, %arg1: i32, %arg2: i32) -> (i32, i32, i32) {
    %c0_i32 = arith.constant 0 : i32
    %c0_i32_0 = arith.constant 0 : i32
    return %arg0, %arg1, %c0_i32 : i32, i32, i32
  }
}

module attributes {stable_mosaic.version = 11 : i64} {
  func.func @_dense_kernel(%arg0: i32, %arg1: i32, %arg2: i32, %arg3: memref<16x32xbf16, #tpu.memory_space<vmem>>, %arg4: memref<32x64xbf16, #tpu.memory_space<vmem>>, %arg5: memref<1x64xf32, #tpu.memory_space<vmem>>, %arg6: memref<16x64xbf16, #tpu.memory_space<vmem>>, %arg7: memref<16x64xf32, #tpu.memory_space<vmem>>) attributes {dimension_semantics = [#tpu.dimension_semantics<parallel>, #tpu.dimension_semantics<parallel>, #tpu.dimension_semantics<arbitrary>], iteration_bounds = array<i64: 1, 1, 1>, scalar_prefetch = 0 : i64, scratch_operands = 1 : i64, tpu.core_type = #tpu.core_type<tc>, window_params = [{transform_indices = @transform_0, window_bounds = array<i64: 16, 32>}, {transform_indices = @transform_1, window_bounds = array<i64: 32, 64>}, {transform_indices = @transform_2, window_bounds = array<i64: 1, 64>}, {transform_indices = @transform_3, window_bounds = array<i64: 16, 64>}]} {
    %c0_i32 = arith.constant 0 : i32
    %0 = arith.cmpi eq, %arg2, %c0_i32 : i32
    %1 = arith.extui %0 : i1 to i32
    %c0_i32_0 = arith.constant 0 : i32
    %2 = arith.cmpi ne, %1, %c0_i32_0 : i32
    scf.if %2 {
      %cst_10 = arith.constant 0.000000e+00 : f32
      %12 = vector.broadcast %cst_10 : f32 to vector<16x64xf32>
      %c0_11 = arith.constant 0 : index
      %c0_12 = arith.constant 0 : index
      %13 = vector.load %arg7[%c0_11, %c0_12] : memref<16x64xf32, #tpu.memory_space<vmem>>, vector<16x64xf32>
      tpu.vector_store %arg7[%c0_11, %c0_12], %12 {strides = array<i32>} : memref<16x64xf32, #tpu.memory_space<vmem>>, vector<16x64xf32>,
    } else {
    }
    %c0 = arith.constant 0 : index
    %c0_1 = arith.constant 0 : index
    %3 = vector.load %arg7[%c0, %c0_1] : memref<16x64xf32, #tpu.memory_space<vmem>>, vector<16x64xf32>
    %c0_2 = arith.constant 0 : index
    %c0_3 = arith.constant 0 : index
    %4 = vector.load %arg3[%c0_2, %c0_3] : memref<16x32xbf16, #tpu.memory_space<vmem>>, vector<16x32xbf16>
    %c0_4 = arith.constant 0 : index
    %c0_5 = arith.constant 0 : index
    %5 = vector.load %arg4[%c0_4, %c0_5] : memref<32x64xbf16, #tpu.memory_space<vmem>>, vector<32x64xbf16>
    %cst = arith.constant dense<0.000000e+00> : vector<16x64xf32>
    %6 = tpu.matmul %4, %5, %cst {dimension_numbers = #tpu.dot_dimension_numbers<[1], [0], [0], [1], [0, 0, 1, 1], [], []>} : vector<16x32xbf16>, vector<32x64xbf16>, vector<16x64xf32> -> vector<16x64xf32>
    %7 = arith.addf %3, %6 : vector<16x64xf32>
    %c0_6 = arith.constant 0 : index
    %c0_7 = arith.constant 0 : index
    %8 = vector.load %arg7[%c0_6, %c0_7] : memref<16x64xf32, #tpu.memory_space<vmem>>, vector<16x64xf32>
    tpu.vector_store %arg7[%c0_6, %c0_7], %7 {strides = array<i32>} : memref<16x64xf32, #tpu.memory_space<vmem>>, vector<16x64xf32>,
    %c0_i32_8 = arith.constant 0 : i32
    %9 = arith.cmpi eq, %arg2, %c0_i32_8 : i32
    %10 = arith.extui %9 : i1 to i32
    %c0_i32_9 = arith.constant 0 : i32
    %11 = arith.cmpi ne, %10, %c0_i32_9 : i32
    scf.if %11 {
      %c0_10 = arith.constant 0 : index
      %c0_11 = arith.constant 0 : index
      %12 = vector.load %arg7[%c0_10, %c0_11] : memref<16x64xf32, #tpu.memory_space<vmem>>, vector<16x64xf32>
      %c0_12 = arith.constant 0 : index
      %c0_13 = arith.constant 0 : index
      %13 = vector.load %arg5[%c0_12, %c0_13] : memref<1x64xf32, #tpu.memory_space<vmem>>, vector<1x64xf32>
      %14 = vector.broadcast %13 : vector<1x64xf32> to vector<16x64xf32>
      %15 = arith.addf %12, %14 : vector<16x64xf32>
      %cst_14 = arith.constant 5.000000e-01 : f32
      %16 = vector.broadcast %cst_14 : f32 to vector<16x64xf32>
      %17 = arith.mulf %16, %15 : vector<16x64xf32>
      %cst_15 = arith.constant 4.471500e-02 : f32
      %18 = vector.broadcast %cst_15 : f32 to vector<16x64xf32>
      %19 = arith.mulf %18, %15 : vector<16x64xf32>
      %20 = arith.mulf %19, %15 : vector<16x64xf32>
      %21 = arith.mulf %20, %15 : vector<16x64xf32>
      %22 = arith.addf %15, %21 : vector<16x64xf32>
      %cst_16 = arith.constant 0.797884583 : f32
      %23 = vector.broadcast %cst_16 : f32 to vector<16x64xf32>
      %24 = arith.mulf %23, %22 : vector<16x64xf32>
      %25 = math.tanh %24 : vector<16x64xf32>
      %cst_17 = arith.constant 1.000000e+00 : f32
      %26 = vector.broadcast %cst_17 : f32 to vector<16x64xf32>
      %27 = arith.addf %26, %25 : vector<16x64xf32>
      %28 = arith.mulf %17, %27 : vector<16x64xf32>
      %29 = arith.truncf %28 : vector<16x64xf32> to vector<16x64xbf16>
      %c0_18 = arith.constant 0 : index
      %c0_19 = arith.constant 0 : index
      %30 = vector.load %arg6[%c0_18, %c0_19] : memref<16x64xbf16, #tpu.memory_space<vmem>>, vector<16x64xbf16>
      tpu.vector_store %arg6[%c0_18, %c0_19], %29 {strides = array<i32>} : memref<16x64xbf16, #tpu.memory_space<vmem>>, vector<16x64xbf16>,
    } else {
    }
    return
  }
  func.func @transform_0(%arg0: i32, %arg1: i32, %arg2: i32) -> (i32, i32) {
    %c0_i32 = arith.constant 0 : i32
    return %arg0, %arg2 : i32, i32
  }
  func.func @transform_1(%arg0: i32, %arg1: i32, %arg2: i32) -> (i32, i32) {
    %c0_i32 = arith.constant 0 : i32
    return %arg2, %arg1 : i32, i32
  }
  func.func @transform_2(%arg0: i32, %arg1: i32, %arg2: i32) -> (i32, i32) {
    %c0_i32 = arith.constant 0 : i32
    %c0_i32_0 = arith.constant 0 : i32
    return %c0_i32, %arg1 : i32, i32
  }
  func.func @transform_3(%arg0: i32, %arg1: i32, %arg2: i32) -> (i32, i32) {
    %c0_i32 = arith.constant 0 : i32
    return %arg0, %arg1 : i32, i32
  }
}

module attributes {stable_mosaic.version = 11 : i64} {
  func.func @_dense_add_ln_kernel(%arg0: i32, %arg1: i32, %arg2: memref<16x64xbf16, #tpu.memory_space<vmem>>, %arg3: memref<64x32xbf16, #tpu.memory_space<vmem>>, %arg4: memref<1x32xf32, #tpu.memory_space<vmem>>, %arg5: memref<16x32xf32, #tpu.memory_space<vmem>>, %arg6: memref<1x32xf32, #tpu.memory_space<vmem>>, %arg7: memref<1x32xf32, #tpu.memory_space<vmem>>, %arg8: memref<16x32xf32, #tpu.memory_space<vmem>>, %arg9: memref<16x32xf32, #tpu.memory_space<vmem>>) attributes {dimension_semantics = [#tpu.dimension_semantics<parallel>, #tpu.dimension_semantics<arbitrary>], iteration_bounds = array<i64: 1, 1>, scalar_prefetch = 0 : i64, scratch_operands = 1 : i64, tpu.core_type = #tpu.core_type<tc>, window_params = [{transform_indices = @transform_0, window_bounds = array<i64: 16, 64>}, {transform_indices = @transform_1, window_bounds = array<i64: 64, 32>}, {pipeline_mode = #tpu.pipeline_mode<synchronous>, transform_indices = @transform_2, window_bounds = array<i64: 1, 32>}, {transform_indices = @transform_3, window_bounds = array<i64: 16, 32>}, {pipeline_mode = #tpu.pipeline_mode<synchronous>, transform_indices = @transform_4, window_bounds = array<i64: 1, 32>}, {pipeline_mode = #tpu.pipeline_mode<synchronous>, transform_indices = @transform_5, window_bounds = array<i64: 1, 32>}, {transform_indices = @transform_6, window_bounds = array<i64: 16, 32>}]} {
    %c0_i32 = arith.constant 0 : i32
    %0 = arith.cmpi eq, %arg1, %c0_i32 : i32
    %1 = arith.extui %0 : i1 to i32
    %c0_i32_0 = arith.constant 0 : i32
    %2 = arith.cmpi ne, %1, %c0_i32_0 : i32
    scf.if %2 {
      %cst_10 = arith.constant 0.000000e+00 : f32
      %12 = vector.broadcast %cst_10 : f32 to vector<16x32xf32>
      %c0_11 = arith.constant 0 : index
      %c0_12 = arith.constant 0 : index
      %13 = vector.load %arg9[%c0_11, %c0_12] : memref<16x32xf32, #tpu.memory_space<vmem>>, vector<16x32xf32>
      tpu.vector_store %arg9[%c0_11, %c0_12], %12 {strides = array<i32>} : memref<16x32xf32, #tpu.memory_space<vmem>>, vector<16x32xf32>,
    } else {
    }
    %c0 = arith.constant 0 : index
    %c0_1 = arith.constant 0 : index
    %3 = vector.load %arg9[%c0, %c0_1] : memref<16x32xf32, #tpu.memory_space<vmem>>, vector<16x32xf32>
    %c0_2 = arith.constant 0 : index
    %c0_3 = arith.constant 0 : index
    %4 = vector.load %arg2[%c0_2, %c0_3] : memref<16x64xbf16, #tpu.memory_space<vmem>>, vector<16x64xbf16>
    %c0_4 = arith.constant 0 : index
    %c0_5 = arith.constant 0 : index
    %5 = vector.load %arg3[%c0_4, %c0_5] : memref<64x32xbf16, #tpu.memory_space<vmem>>, vector<64x32xbf16>
    %cst = arith.constant dense<0.000000e+00> : vector<16x32xf32>
    %6 = tpu.matmul %4, %5, %cst {dimension_numbers = #tpu.dot_dimension_numbers<[1], [0], [0], [1], [0, 0, 1, 1], [], []>} : vector<16x64xbf16>, vector<64x32xbf16>, vector<16x32xf32> -> vector<16x32xf32>
    %7 = arith.addf %3, %6 : vector<16x32xf32>
    %c0_6 = arith.constant 0 : index
    %c0_7 = arith.constant 0 : index
    %8 = vector.load %arg9[%c0_6, %c0_7] : memref<16x32xf32, #tpu.memory_space<vmem>>, vector<16x32xf32>
    tpu.vector_store %arg9[%c0_6, %c0_7], %7 {strides = array<i32>} : memref<16x32xf32, #tpu.memory_space<vmem>>, vector<16x32xf32>,
    %c0_i32_8 = arith.constant 0 : i32
    %9 = arith.cmpi eq, %arg1, %c0_i32_8 : i32
    %10 = arith.extui %9 : i1 to i32
    %c0_i32_9 = arith.constant 0 : i32
    %11 = arith.cmpi ne, %10, %c0_i32_9 : i32
    scf.if %11 {
      %c0_10 = arith.constant 0 : index
      %c0_11 = arith.constant 0 : index
      %12 = vector.load %arg9[%c0_10, %c0_11] : memref<16x32xf32, #tpu.memory_space<vmem>>, vector<16x32xf32>
      %c0_12 = arith.constant 0 : index
      %c0_13 = arith.constant 0 : index
      %13 = vector.load %arg4[%c0_12, %c0_13] : memref<1x32xf32, #tpu.memory_space<vmem>>, vector<1x32xf32>
      %14 = vector.broadcast %13 : vector<1x32xf32> to vector<16x32xf32>
      %15 = arith.addf %12, %14 : vector<16x32xf32>
      %c0_14 = arith.constant 0 : index
      %c0_15 = arith.constant 0 : index
      %16 = vector.load %arg5[%c0_14, %c0_15] : memref<16x32xf32, #tpu.memory_space<vmem>>, vector<16x32xf32>
      %17 = arith.addf %15, %16 : vector<16x32xf32>
      %cst_16 = arith.constant dense<0.000000e+00> : vector<16xf32>
      %18 = vector.multi_reduction <add>, %17, %cst_16 [1] : vector<16x32xf32> to vector<16xf32>
      %19 = vector.shape_cast %18 : vector<16xf32> to vector<16x1xf32>
      %cst_17 = arith.constant 3.200000e+01 : f32
      %20 = vector.broadcast %cst_17 : f32 to vector<16x1xf32>
      %21 = arith.divf %19, %20 : vector<16x1xf32>
      %22 = vector.broadcast %21 : vector<16x1xf32> to vector<16x32xf32>
      %23 = arith.subf %17, %22 : vector<16x32xf32>
      %24 = arith.mulf %23, %23 : vector<16x32xf32>
      %cst_18 = arith.constant dense<0.000000e+00> : vector<16xf32>
      %25 = vector.multi_reduction <add>, %24, %cst_18 [1] : vector<16x32xf32> to vector<16xf32>
      %26 = vector.shape_cast %25 : vector<16xf32> to vector<16x1xf32>
      %cst_19 = arith.constant 3.200000e+01 : f32
      %27 = vector.broadcast %cst_19 : f32 to vector<16x1xf32>
      %28 = arith.divf %26, %27 : vector<16x1xf32>
      %cst_20 = arith.constant 1.000000e-07 : f32
      %29 = vector.broadcast %cst_20 : f32 to vector<16x1xf32>
      %30 = arith.addf %28, %29 : vector<16x1xf32>
      %31 = math.rsqrt %30 : vector<16x1xf32>
      %32 = vector.broadcast %31 : vector<16x1xf32> to vector<16x32xf32>
      %33 = arith.mulf %23, %32 : vector<16x32xf32>
      %c0_21 = arith.constant 0 : index
      %c0_22 = arith.constant 0 : index
      %34 = vector.load %arg6[%c0_21, %c0_22] : memref<1x32xf32, #tpu.memory_space<vmem>>, vector<1x32xf32>
      %35 = vector.broadcast %34 : vector<1x32xf32> to vector<16x32xf32>
      %36 = arith.mulf %33, %35 : vector<16x32xf32>
      %c0_23 = arith.constant 0 : index
      %c0_24 = arith.constant 0 : index
      %37 = vector.load %arg7[%c0_23, %c0_24] : memref<1x32xf32, #tpu.memory_space<vmem>>, vector<1x32xf32>
      %38 = vector.broadcast %37 : vector<1x32xf32> to vector<16x32xf32>
      %39 = arith.addf %36, %38 : vector<16x32xf32>
      %c0_25 = arith.constant 0 : index
      %c0_26 = arith.constant 0 : index
      %40 = vector.load %arg8[%c0_25, %c0_26] : memref<16x32xf32, #tpu.memory_space<vmem>>, vector<16x32xf32>
      tpu.vector_store %arg8[%c0_25, %c0_26], %39 {strides = array<i32>} : memref<16x32xf32, #tpu.memory_space<vmem>>, vector<16x32xf32>,
    } else {
    }
    return
  }
  func.func @transform_0(%arg0: i32, %arg1: i32) -> (i32, i32) {
    %c0_i32 = arith.constant 0 : i32
    return %arg0, %arg1 : i32, i32
  }
  func.func @transform_1(%arg0: i32, %arg1: i32) -> (i32, i32) {
    %c0_i32 = arith.constant 0 : i32
    %c0_i32_0 = arith.constant 0 : i32
    return %arg1, %c0_i32 : i32, i32
  }
  func.func @transform_2(%arg0: i32, %arg1: i32) -> (i32, i32) {
    %c0_i32 = arith.constant 0 : i32
    %c0_i32_0 = arith.constant 0 : i32
    %c0_i32_1 = arith.constant 0 : i32
    return %c0_i32, %c0_i32_0 : i32, i32
  }
  func.func @transform_3(%arg0: i32, %arg1: i32) -> (i32, i32) {
    %c0_i32 = arith.constant 0 : i32
    %c0_i32_0 = arith.constant 0 : i32
    return %arg0, %c0_i32 : i32, i32
  }
  func.func @transform_4(%arg0: i32, %arg1: i32) -> (i32, i32) {
    %c0_i32 = arith.constant 0 : i32
    %c0_i32_0 = arith.constant 0 : i32
    %c0_i32_1 = arith.constant 0 : i32
    return %c0_i32, %c0_i32_0 : i32, i32
  }
  func.func @transform_5(%arg0: i32, %arg1: i32) -> (i32, i32) {
    %c0_i32 = arith.constant 0 : i32
    %c0_i32_0 = arith.constant 0 : i32
    %c0_i32_1 = arith.constant 0 : i32
    return %c0_i32, %c0_i32_0 : i32, i32
  }
  func.func @transform_6(%arg0: i32, %arg1: i32) -> (i32, i32) {
    %c0_i32 = arith.constant 0 : i32
    %c0_i32_0 = arith.constant 0 : i32
    return %arg0, %c0_i32 : i32, i32
  }
}

module attributes {stable_mosaic.version = 11 : i64} {
  func.func @_dense_add_ln_kernel(%arg0: i32, %arg1: i32, %arg2: memref<16x64xbf16, #tpu.memory_space<vmem>>, %arg3: memref<64x32xbf16, #tpu.memory_space<vmem>>, %arg4: memref<1x32xf32, #tpu.memory_space<vmem>>, %arg5: memref<16x32xf32, #tpu.memory_space<vmem>>, %arg6: memref<1x32xf32, #tpu.memory_space<vmem>>, %arg7: memref<1x32xf32, #tpu.memory_space<vmem>>, %arg8: memref<16x32xf32, #tpu.memory_space<vmem>>, %arg9: memref<16x32xf32, #tpu.memory_space<vmem>>, %arg10: memref<16x32xf32, #tpu.memory_space<vmem>>) attributes {dimension_semantics = [#tpu.dimension_semantics<parallel>, #tpu.dimension_semantics<arbitrary>], iteration_bounds = array<i64: 1, 1>, scalar_prefetch = 0 : i64, scratch_operands = 1 : i64, tpu.core_type = #tpu.core_type<tc>, window_params = [{transform_indices = @transform_0, window_bounds = array<i64: 16, 64>}, {transform_indices = @transform_1, window_bounds = array<i64: 64, 32>}, {pipeline_mode = #tpu.pipeline_mode<synchronous>, transform_indices = @transform_2, window_bounds = array<i64: 1, 32>}, {transform_indices = @transform_3, window_bounds = array<i64: 16, 32>}, {pipeline_mode = #tpu.pipeline_mode<synchronous>, transform_indices = @transform_4, window_bounds = array<i64: 1, 32>}, {pipeline_mode = #tpu.pipeline_mode<synchronous>, transform_indices = @transform_5, window_bounds = array<i64: 1, 32>}, {transform_indices = @transform_6, window_bounds = array<i64: 16, 32>}, {transform_indices = @transform_7, window_bounds = array<i64: 16, 32>}]} {
    %c0_i32 = arith.constant 0 : i32
    %0 = arith.cmpi eq, %arg1, %c0_i32 : i32
    %1 = arith.extui %0 : i1 to i32
    %c0_i32_0 = arith.constant 0 : i32
    %2 = arith.cmpi ne, %1, %c0_i32_0 : i32
    scf.if %2 {
      %cst_10 = arith.constant 0.000000e+00 : f32
      %12 = vector.broadcast %cst_10 : f32 to vector<16x32xf32>
      %c0_11 = arith.constant 0 : index
      %c0_12 = arith.constant 0 : index
      %13 = vector.load %arg10[%c0_11, %c0_12] : memref<16x32xf32, #tpu.memory_space<vmem>>, vector<16x32xf32>
      tpu.vector_store %arg10[%c0_11, %c0_12], %12 {strides = array<i32>} : memref<16x32xf32, #tpu.memory_space<vmem>>, vector<16x32xf32>,
    } else {
    }
    %c0 = arith.constant 0 : index
    %c0_1 = arith.constant 0 : index
    %3 = vector.load %arg10[%c0, %c0_1] : memref<16x32xf32, #tpu.memory_space<vmem>>, vector<16x32xf32>
    %c0_2 = arith.constant 0 : index
    %c0_3 = arith.constant 0 : index
    %4 = vector.load %arg2[%c0_2, %c0_3] : memref<16x64xbf16, #tpu.memory_space<vmem>>, vector<16x64xbf16>
    %c0_4 = arith.constant 0 : index
    %c0_5 = arith.constant 0 : index
    %5 = vector.load %arg3[%c0_4, %c0_5] : memref<64x32xbf16, #tpu.memory_space<vmem>>, vector<64x32xbf16>
    %cst = arith.constant dense<0.000000e+00> : vector<16x32xf32>
    %6 = tpu.matmul %4, %5, %cst {dimension_numbers = #tpu.dot_dimension_numbers<[1], [0], [0], [1], [0, 0, 1, 1], [], []>} : vector<16x64xbf16>, vector<64x32xbf16>, vector<16x32xf32> -> vector<16x32xf32>
    %7 = arith.addf %3, %6 : vector<16x32xf32>
    %c0_6 = arith.constant 0 : index
    %c0_7 = arith.constant 0 : index
    %8 = vector.load %arg10[%c0_6, %c0_7] : memref<16x32xf32, #tpu.memory_space<vmem>>, vector<16x32xf32>
    tpu.vector_store %arg10[%c0_6, %c0_7], %7 {strides = array<i32>} : memref<16x32xf32, #tpu.memory_space<vmem>>, vector<16x32xf32>,
    %c0_i32_8 = arith.constant 0 : i32
    %9 = arith.cmpi eq, %arg1, %c0_i32_8 : i32
    %10 = arith.extui %9 : i1 to i32
    %c0_i32_9 = arith.constant 0 : i32
    %11 = arith.cmpi ne, %10, %c0_i32_9 : i32
    scf.if %11 {
      %c0_10 = arith.constant 0 : index
      %c0_11 = arith.constant 0 : index
      %12 = vector.load %arg10[%c0_10, %c0_11] : memref<16x32xf32, #tpu.memory_space<vmem>>, vector<16x32xf32>
      %c0_12 = arith.constant 0 : index
      %c0_13 = arith.constant 0 : index
      %13 = vector.load %arg4[%c0_12, %c0_13] : memref<1x32xf32, #tpu.memory_space<vmem>>, vector<1x32xf32>
      %14 = vector.broadcast %13 : vector<1x32xf32> to vector<16x32xf32>
      %15 = arith.addf %12, %14 : vector<16x32xf32>
      %c0_14 = arith.constant 0 : index
      %c0_15 = arith.constant 0 : index
      %16 = vector.load %arg5[%c0_14, %c0_15] : memref<16x32xf32, #tpu.memory_space<vmem>>, vector<16x32xf32>
      %17 = arith.addf %15, %16 : vector<16x32xf32>
      %cst_16 = arith.constant dense<0.000000e+00> : vector<16xf32>
      %18 = vector.multi_reduction <add>, %17, %cst_16 [1] : vector<16x32xf32> to vector<16xf32>
      %19 = vector.shape_cast %18 : vector<16xf32> to vector<16x1xf32>
      %cst_17 = arith.constant 3.200000e+01 : f32
      %20 = vector.broadcast %cst_17 : f32 to vector<16x1xf32>
      %21 = arith.divf %19, %20 : vector<16x1xf32>
      %22 = vector.broadcast %21 : vector<16x1xf32> to vector<16x32xf32>
      %23 = arith.subf %17, %22 : vector<16x32xf32>
      %24 = arith.mulf %23, %23 : vector<16x32xf32>
      %cst_18 = arith.constant dense<0.000000e+00> : vector<16xf32>
      %25 = vector.multi_reduction <add>, %24, %cst_18 [1] : vector<16x32xf32> to vector<16xf32>
      %26 = vector.shape_cast %25 : vector<16xf32> to vector<16x1xf32>
      %cst_19 = arith.constant 3.200000e+01 : f32
      %27 = vector.broadcast %cst_19 : f32 to vector<16x1xf32>
      %28 = arith.divf %26, %27 : vector<16x1xf32>
      %cst_20 = arith.constant 1.000000e-07 : f32
      %29 = vector.broadcast %cst_20 : f32 to vector<16x1xf32>
      %30 = arith.addf %28, %29 : vector<16x1xf32>
      %31 = math.rsqrt %30 : vector<16x1xf32>
      %32 = vector.broadcast %31 : vector<16x1xf32> to vector<16x32xf32>
      %33 = arith.mulf %23, %32 : vector<16x32xf32>
      %c0_21 = arith.constant 0 : index
      %c0_22 = arith.constant 0 : index
      %34 = vector.load %arg6[%c0_21, %c0_22] : memref<1x32xf32, #tpu.memory_space<vmem>>, vector<1x32xf32>
      %35 = vector.broadcast %34 : vector<1x32xf32> to vector<16x32xf32>
      %36 = arith.mulf %33, %35 : vector<16x32xf32>
      %c0_23 = arith.constant 0 : index
      %c0_24 = arith.constant 0 : index
      %37 = vector.load %arg7[%c0_23, %c0_24] : memref<1x32xf32, #tpu.memory_space<vmem>>, vector<1x32xf32>
      %38 = vector.broadcast %37 : vector<1x32xf32> to vector<16x32xf32>
      %39 = arith.addf %36, %38 : vector<16x32xf32>
      %c0_25 = arith.constant 0 : index
      %c0_26 = arith.constant 0 : index
      %40 = vector.load %arg8[%c0_25, %c0_26] : memref<16x32xf32, #tpu.memory_space<vmem>>, vector<16x32xf32>
      %41 = arith.addf %39, %40 : vector<16x32xf32>
      %cst_27 = arith.constant 5.000000e-01 : f32
      %42 = vector.broadcast %cst_27 : f32 to vector<16x32xf32>
      %43 = arith.mulf %42, %41 : vector<16x32xf32>
      %c0_28 = arith.constant 0 : index
      %c0_29 = arith.constant 0 : index
      %44 = vector.load %arg9[%c0_28, %c0_29] : memref<16x32xf32, #tpu.memory_space<vmem>>, vector<16x32xf32>
      tpu.vector_store %arg9[%c0_28, %c0_29], %43 {strides = array<i32>} : memref<16x32xf32, #tpu.memory_space<vmem>>, vector<16x32xf32>,
    } else {
    }
    return
  }
  func.func @transform_0(%arg0: i32, %arg1: i32) -> (i32, i32) {
    %c0_i32 = arith.constant 0 : i32
    return %arg0, %arg1 : i32, i32
  }
  func.func @transform_1(%arg0: i32, %arg1: i32) -> (i32, i32) {
    %c0_i32 = arith.constant 0 : i32
    %c0_i32_0 = arith.constant 0 : i32
    return %arg1, %c0_i32 : i32, i32
  }
  func.func @transform_2(%arg0: i32, %arg1: i32) -> (i32, i32) {
    %c0_i32 = arith.constant 0 : i32
    %c0_i32_0 = arith.constant 0 : i32
    %c0_i32_1 = arith.constant 0 : i32
    return %c0_i32, %c0_i32_0 : i32, i32
  }
  func.func @transform_3(%arg0: i32, %arg1: i32) -> (i32, i32) {
    %c0_i32 = arith.constant 0 : i32
    %c0_i32_0 = arith.constant 0 : i32
    return %arg0, %c0_i32 : i32, i32
  }
  func.func @transform_4(%arg0: i32, %arg1: i32) -> (i32, i32) {
    %c0_i32 = arith.constant 0 : i32
    %c0_i32_0 = arith.constant 0 : i32
    %c0_i32_1 = arith.constant 0 : i32
    return %c0_i32, %c0_i32_0 : i32, i32
  }
  func.func @transform_5(%arg0: i32, %arg1: i32) -> (i32, i32) {
    %c0_i32 = arith.constant 0 : i32
    %c0_i32_0 = arith.constant 0 : i32
    %c0_i32_1 = arith.constant 0 : i32
    return %c0_i32, %c0_i32_0 : i32, i32
  }
  func.func @transform_6(%arg0: i32, %arg1: i32) -> (i32, i32) {
    %c0_i32 = arith.constant 0 : i32
    %c0_i32_0 = arith.constant 0 : i32
    return %arg0, %c0_i32 : i32, i32
  }
  func.func @transform_7(%arg0: i32, %arg1: i32) -> (i32, i32) {
    %c0_i32 = arith.constant 0 : i32
    %c0_i32_0 = arith.constant 0 : i32
    return %arg0, %c0_i32 : i32, i32
  }
}

</mosaic_0001>

<bundles_post_ra>
// kernel: run.15
= control target key start
LH: loop header
LB: loop body
LE: loop exit
PB: predicated region body
PF: predicated region fallthrough
CT: control target
= control target key end

     0   :  { %vm19_vm0 = vcmask 261120   ;;  %v107_v1 = vmov 0.0   ;;  %vm82_vm1 = vcmask 257024   ;;  %s151_s1 = inlined_call_operand.vmem [shape: bf16[32,32], index: 1, kind: input, shape index: {}]   ;;  %s152_s2 = inlined_call_operand.vmem [shape: f32[1,32], index: 2, kind: input, shape index: {}]   ;;  %s153_s0 = inlined_call_operand.vmem [shape: bf16[16,32], index: 0, kind: input, shape index: {}]   ;;  %s154_s3 = inlined_call_operand.vmem [shape: bf16[16,32], index: 3, kind: output, shape index: {}]  }
   0x1   :  { %v104_v0 = vld [vmem:[%s151_s1 + $0x8] sm:$0xff]  ;;  %20 = vst.msk [vmem:[#allocation2] sm:$0xff] %vm19_vm0, %v107_v1  ;;  %v103_v2 = vld [vmem:[%s151_s1] sm:$0xff] }
   0x2   :  { %21 = vst.msk [vmem:[#allocation2 + $0x8] sm:$0xff] %vm19_vm0, %v107_v1  ;;  %57 = vmatpush.bf16.msra.mxu0 %v104_v0  ;;  %v102_v3 = vld [vmem:[%s153_s0] sm:$0xff] }
   0x3   :  { %v106_v8 = vld [vmem:[%s152_s2] ss:$0 sm:$0xff] }
   0x6   :  { %58 = vmatpush.bf16.msra.mxu0 %v103_v2 }
   0x8   :  { %v22_v4 = vld [vmem:[#allocation2] sm:$0xff] }
   0x9   :  { %101 = vmatmul.msk.bf16.vlgmr.msra.gmra.mxu0 %vm19_vm0, %v102_v3  ;;  %v23_v7 = vld [vmem:[#allocation2 + $0x8] sm:$0xff] }
  0x86   :  { %v60_v5 = vpop.f32.mrf.mxu0 }
  0x87   :  { %v65_v6 = vadd.f32 %v60_v5, %v22_v4 }
  0x89   :  { %67 = vst.msk [vmem:[#allocation2] sm:$0xff] %vm19_vm0, %v65_v6 }
  0x8e   :  { %v62_v9 = vpop.f32.mrf.mxu0 }
  0x8f   :  { %v66_v10 = vadd.f32 %v62_v9, %v23_v7 }
  0x90   :  { %v72_v11 = vld [vmem:[#allocation2] sm:$0xff] }
  0x91   :  { %v78_v12 = vadd.f32 %v106_v8, %v72_v11  ;;  %68 = vst.msk [vmem:[#allocation2 + $0x8] sm:$0xff] %vm19_vm0, %v66_v10 }
  0x93   :  { %v80_v13 = vpack.c.bf16 %v78_v12, %v78_v12 }
  0x95   :  { %83 = vst.msk [vmem:[%s154_s3] sm:$0xf] %vm82_vm1, %v80_v13 }
  0x98   :  { %v73_v14 = vld [vmem:[#allocation2 + $0x8] sm:$0xff] }
  0x99   :  { %v79_v15 = vadd.f32 %v106_v8, %v73_v14 }
  0x9b   :  { %v81_v16 = vpack.c.bf16 %v79_v15, %v79_v15 }
  0x9d   :  { %84 = vst.msk [vmem:[%s154_s3 + $0x4] sm:$0xf] %vm82_vm1, %v81_v16 }

// kernel: run.14
= control target key start
LH: loop header
LB: loop body
LE: loop exit
PB: predicated region body
PF: predicated region fallthrough
CT: control target
= control target key end

     0   :  { %vm19_vm0 = vcmask 785408   ;;  %v108_v1 = vmov 0.0   ;;  %vm47_vm1 = vcmask 261120   ;;  %vm83_vm2 = vcmask 781312   ;;  %s151_s1 = inlined_call_operand.vmem [shape: bf16[32,96], index: 1, kind: input, shape index: {}]   ;;  %s152_s2 = inlined_call_operand.vmem [shape: f32[1,96], index: 2, kind: input, shape index: {}]   ;;  %s153_s0 = inlined_call_operand.vmem [shape: bf16[16,32], index: 0, kind: input, shape index: {}]   ;;  %s154_s3 = inlined_call_operand.vmem [shape: bf16[16,96], index: 3, kind: output, shape index: {}]  }
   0x1   :  { %v105_v0 = vld [vmem:[%s151_s1 + $0x8] sm:$0xff]  ;;  %20 = vst.msk [vmem:[#allocation2] sm:$0xff] %vm19_vm0, %v108_v1  ;;  %v104_v2 = vld [vmem:[%s151_s1] sm:$0xff] }
   0x2   :  { %21 = vst.msk [vmem:[#allocation2 + $0x8] sm:$0xff] %vm19_vm0, %v108_v1  ;;  %57 = vmatpush.bf16.msra.mxu0 %v105_v0  ;;  %v103_v3 = vld [vmem:[%s153_s0] sm:$0xff] }
   0x3   :  { %v107_v8 = vld [vmem:[%s152_s2] ss:$0 sm:$0xff] }
   0x6   :  { %58 = vmatpush.bf16.msra.mxu0 %v104_v2 }
   0x8   :  { %v22_v4 = vld [vmem:[#allocation2] sm:$0xff] }
   0x9   :  { %102 = vmatmul.msk.bf16.vlgmr.msra.gmra.mxu0 %vm47_vm1, %v103_v3  ;;  %v23_v7 = vld [vmem:[#allocation2 + $0x8] sm:$0xff] }
  0x86   :  { %v60_v5 = vpop.f32.mrf.mxu0 }
  0x87   :  { %v65_v6 = vadd.f32 %v60_v5, %v22_v4 }
  0x89   :  { %68 = vst.msk [vmem:[#allocation2] sm:$0xff] %vm19_vm0, %v65_v6 }
  0x8e   :  { %v62_v9 = vpop.f32.mrf.mxu0 }
  0x8f   :  { %v66_v10 = vadd.f32 %v62_v9, %v23_v7 }
  0x90   :  { %v73_v11 = vld [vmem:[#allocation2] sm:$0xff] }
  0x91   :  { %v79_v12 = vadd.f32 %v107_v8, %v73_v11  ;;  %69 = vst.msk [vmem:[#allocation2 + $0x8] sm:$0xff] %vm19_vm0, %v66_v10 }
  0x93   :  { %v81_v13 = vpack.c.bf16 %v79_v12, %v79_v12 }
  0x95   :  { %84 = vst.msk [vmem:[%s154_s3] sm:$0xf] %vm83_vm2, %v81_v13 }
  0x98   :  { %v74_v14 = vld [vmem:[#allocation2 + $0x8] sm:$0xff] }
  0x99   :  { %v80_v15 = vadd.f32 %v107_v8, %v74_v14 }
  0x9b   :  { %v82_v16 = vpack.c.bf16 %v80_v15, %v80_v15 }
  0x9d   :  { %85 = vst.msk [vmem:[%s154_s3 + $0x4] sm:$0xf] %vm83_vm2, %v82_v16 }

// kernel: run.17
= control target key start
LH: loop header
LB: loop body
LE: loop exit
PB: predicated region body
PF: predicated region fallthrough
CT: control target
= control target key end

     0   :  { %s592_s12 = smov 0   ;;  %s594_s13 = smov 0   ;;  %s664_s0 = inlined_call_operand.vmem [shape: bf16[2,4,8,24], index: 0, kind: input, shape index: {}]   ;;  %s665_s1 = inlined_call_operand.vmem [shape: bf16[2,4,8,8], index: 1, kind: input, shape index: {}]   ;;  %s666_s2 = inlined_call_operand.vmem [shape: f32[2,1,8], index: 2, kind: input, shape index: {}]   ;;  %s667_s3 = inlined_call_operand.vmem [shape: bf16[2,4,8,8], index: 3, kind: output, shape index: {}]  }
   0x1   :  { %s596_s14 = smov 0   ;;  %s598_s15 = smov 0  }
   0x2   :  { %s600_s16 = smov 0  }
   0x3 LB: > { %s22_s17 = sadd.s32 1, %s559_s14  ;;  %s25_s18 = sadd.s32 1, %s563_s15  ;;  %s567_s16 = sphi %s600_s16, %s13_s16   ;;  %s563_s15 = sphi %s598_s15, %s671_s15   ;;  %s559_s14 = sphi %s596_s14, %s670_s14   ;;  %s555_s13 = sphi %s594_s13, %s669_s13   ;;  %s551_s12 = sphi %s592_s12, %s668_s12  }
   0x4   : > { %p23_p0 = scmp.ge.s32.totalorder %s22_s17, 4  ;;  %p470_p1 = scmp.ge.s32.totalorder %s567_s16, 1 }
   0x5   : > { %p179_p2 = scmp.lt.s32.totalorder %s567_s16, 9 }
   0x6   : > { %s673_s17 = smov (%p23_p0, %s22_s17), 0  ;;  %s675_s18 = smov (!%p23_p0, %s25_s18), %s563_s15 }
   0x7   : > { %p180_p3 = pnand %p470_p1, %p179_p2  ;;  %p27_p4 = scmp.ge.s32.totalorder %s675_s18, 2 }
   0x8   : > { %p220_p5 = scmp.lt.s32.totalorder (!%p180_p3), %s555_s13, 1  ;;  %p222_p6 = scmp.lt.s32.totalorder (!%p180_p3), %s551_s12, 3 }
   0x9   : > { %s677_s18 = smov (%p27_p4, %s675_s18), 0  ;;  %183 = sbr.rel (%p180_p3) target bundleno = 843 (0x34b), region = 32 }
   0xa   : > { %s569_s25 = smov (!%p180_p3), 120   ;;  %s571_s5 = smov (!%p180_p3), 112  }
   0xe   : > { %s679_s13 = smov (!%p220_p5, %s555_s13), 1  ;;  %s681_s12 = smov (!%p222_p6, %s551_s12), 3  ;;  %vm256_vm0 = vcmask 64512   ;;  %v570_v7 = vmov 0   ;;  %vm351_vm7 = vcmask 60416  }
   0xf   : > { %s471_s19 = sshll.u32 %s679_s13, 2  ;;  %s633_s28 = scalar_lea.vmem %s666_s2, %s679_s13 }
  0x10   : > { %s225_s20 = sadd.s32 %s471_s19, %s681_s12  ;;  %v277_v5 = vld [vmem:[%s633_s28] sm:$0x1] }
  0x11   : > { %s622_s21 = sshll.u32 %s225_s20, 2  ;;  %vm278_vm1 = vcmp.gt.f32.partialorder %v277_v5, 0.0  ;;  %v524_v38 = vld [vmem:[%s633_s28] ss:$0 sm:$0xff] }
  0x12   : > { %s227_s24 = scalar_lea.vmem %s664_s0, %s622_s21  ;;  %s235_s4 = scalar_lea.vmem %s665_s1, %s622_s21  ;;  %v279_v8 = vsel %vm278_vm1, 1, %v570_v7 }
  0x13   : > { %v248_v0 = vld [vmem:[%s227_s24] sm:$0xf]  ;;  %v280_v10 = vperm.slane %v279_v8, 0  ;;  %s246_s8 = scalar_lea.vmem %s667_s3, %s622_s21 }
  0x14   : > { %v252_v1 = vunpack.c.l.b16 %v248_v0  ;;  %v249_v6 = vld [vmem:[%s235_s4] sm:$0xf] }
  0x15   : > { %v250_v9 = vunpack.c.l.bf16 %v249_v6  ;;  %vm281_vm2 = vcmp.eq.s32.totalorder %v280_v10, 1 }
  0x16   : > { %v253_v2 = vpack.c.b16 %v252_v1, %v252_v1 }
  0x18   : > { %254 = vrot.lane.b32.xlu0 %v253_v2, %s569_s25 }
  0x8a   : > { %v255_v3 = vpop.permute.xlu0 %254 }
  0x8b   : > { %v261_v4 = vsel %vm256_vm0, %v255_v3, 0 }
  0x8c   : > { %270 = vmatpush.bf16.xpose.msra.mxu0 %v261_v4 }
  0x93   : > { %477 = vmatmul.msk.bf16.vlgmr.msra.gmra.mxu0 %vm256_vm0, %v248_v0 }
 0x110   : > { %v272_v11 = vpop.f32.mrf.mxu0 }
 0x111   : > { %v273_v12 = vadd.f32 %v272_v11, %v250_v9 }
 0x113   : > { %v276_v13 = vmul.f32 0.20412415, %v273_v12 }
 0x115   : > { %v282_v14 = vsel %vm281_vm2, %v276_v13, -3.4028235e+38 }
 0x116   : > { %v283_v15 = vsel %vm256_vm0, %v282_v14, -inf }
 0x117   : > { %284 = vmax.xlane.f32.xlu0 %v283_v15 }
 0x118   : > { %v274_v16 = vpop.f32.mrf.mxu0 }
 0x18a   : > { %v285_v17 = vpop.xlane.xlu0 %284 }
 0x18b   : > { %v286_v18 = vsub.f32 %v282_v14, %v285_v17 }
 0x18d   : > { %v287_v19 = vmul.f32 1.442695, %v286_v18 }
 0x18f   : > { %525 = vpow2.f32 %v287_v19 }
 0x195   : > { %v526_v20 = vpop.eup %525 }
 0x196   : > { %v289_v21 = vsel %vm256_vm0, %v526_v20, 0.0 }
 0x197   : > { %290 = vadd.xlane.f32.xlu1 %v289_v21 }
 0x1b0   : > { %308 = vrot.lane.b32.xlu1 %v253_v2, %s571_s5 }
 0x20a   : > { %v291_v22 = vpop.xlane.xlu1 %290 }
 0x20b   : > { %527 = vrcp.f32 %v291_v22  ;;  %v303_v26 = vand.u32 2147483648, %v291_v22  ;;  %v301_v28 = vand.u32 2147483647, %v291_v22  ;;  %vm297_vm4 = vweird.f32 %v291_v22 }
 0x20d   : > { %v304_v30 = vor.u32 1.1754944e-38, %v303_v26  ;;  %vm302_vm6 = vcmp.eq.f32.partialorder %v301_v28, 8.507059e+37 }
 0x211   : > { %v528_v23 = vpop.eup %527 }
 0x212   : > { %v293_v24 = vmul.f32 %v528_v23, %v291_v22  ;;  %vm298_vm3 = vweird.f32 %v528_v23 }
 0x213   : > { %vm299_vm5 = vmor %vm297_vm4, %vm298_vm3 }
 0x214   : > { %v294_v25 = vsub.f32 1.0, %v293_v24 }
 0x216   : > { %v295_v27 = vmul.f32 %v528_v23, %v294_v25 }
 0x218   : > { %v296_v29 = vadd.f32 %v528_v23, %v295_v27 }
 0x21a   : > { %v300_v31 = vsel %vm299_vm5, %v528_v23, %v296_v29 }
 0x21b   : > { %v305_v32 = vsel %vm302_vm6, %v304_v30, %v300_v31 }
 0x21c   : > { %v306_v33 = vmul.f32 %v526_v20, %v305_v32 }
 0x21e   : > { %v307_v34 = vpack.c.bf16 %v306_v33, %v306_v33 }
 0x220   : > { %v331_v35 = vsel %vm256_vm0, %v307_v34, 0 }
 0x221   : > { %340 = vmatpush.bf16.xpose.msra.mxu1 %v331_v35 }
 0x222   : > { %v309_v36 = vpop.permute.xlu1 %308 }
 0x223   : > { %311 = vxpose.xlu2.c.b16.start.end [1/1] (short) (narrow) %v309_v36, 16 }
 0x2c4   : > { %v319_v37 = vpop.trf.xlu2 }
 0x2c5   : > { %478 = vmatmul.msk.bf16.vlgmr.msra.gmra.mxu1 %vm256_vm0, %v319_v37 }
 0x342   : > { %v342_v39 = vpop.f32.mrf.mxu1 }
 0x343   : > { %v349_v40 = vmul.f32 %v524_v38, %v342_v39 }
 0x345   : > { %v350_v41 = vpack.c.bf16 %v349_v40, %v349_v40 }
 0x347   : > { %352 = vst.msk [vmem:[%s246_s8] sm:$0xf] %vm351_vm7, %v350_v41 }
 0x34a   : > { %v344_v42 = vpop.f32.mrf.mxu1 }
 0x34b PF: > { %s13_s16 = sadd.s32 1, %s567_s16   ;;  %s668_s12 = smov %s559_s14 }
 0x34c   : > { %p10_p7 = scmp.ge.s32.totalorder %s13_s16, 10   ;;  %s669_s13 = smov %s563_s15 }
 0x34d   : > { %s670_s14 = smov %s673_s17  ;;  %s671_s15 = smov %s677_s18 }
 0x34e   :  { %12 = sbr.rel (!%p10_p7) target bundleno = 3 (0x3), region = 68 }

// kernel: run.18
= control target key start
LH: loop header
LB: loop body
LE: loop exit
PB: predicated region body
PF: predicated region fallthrough
CT: control target
= control target key end

     0   :  { %s723_s21 = smov 0   ;;  %s725_s22 = smov 0   ;;  %s788_s0 = inlined_call_operand.vmem [shape: bf16[2,32,8], index: 0, kind: input, shape index: {}]   ;;  %s789_s1 = inlined_call_operand.vmem [shape: bf16[32,32], index: 1, kind: input, shape index: {}]   ;;  %s790_s2 = inlined_call_operand.vmem [shape: f32[1,32], index: 2, kind: input, shape index: {}]   ;;  %s791_s3 = inlined_call_operand.vmem [shape: f32[2,8,32], index: 3, kind: input, shape index: {}]   ;;  %s792_s4 = inlined_call_operand.vmem [shape: f32[1,32], index: 4, kind: input, shape index: {}]   ;;  %s793_s5 = inlined_call_operand.vmem [shape: f32[1,32], index: 5, kind: input, shape index: {}]   ;;  %s794_s6 = inlined_call_operand.vmem [shape: f32[2,8,32], index: 6, kind: output, shape index: {}]  }
   0x1   :  { %s727_s23 = smov 0  }
   0x2 LB: > { %s35_s24 = sadd.s32 1, %s680_s22  ;;  %p599_p0 = scmp.ge.s32.totalorder %s684_s23, 1  ;;  %s684_s23 = sphi %s727_s23, %s16_s23   ;;  %s680_s22 = sphi %s725_s22, %s796_s22   ;;  %s676_s21 = sphi %s723_s21, %s795_s21  }
   0x3   : > { %p37_p1 = scmp.ge.s32.totalorder %s35_s24, 2  ;;  %p270_p2 = scmp.lt.s32.totalorder %s684_s23, 3 }
   0x5   : > { %s798_s24 = smov (%p37_p1, %s35_s24), 0  ;;  %p271_p3 = pnand %p599_p0, %p270_p2 }
   0x6   : > { %p322_p4 = scmp.lt.s32.totalorder (!%p271_p3), %s676_s21, 1 }
   0x7   : > { %274 = sbr.rel (%p271_p3) target bundleno = 598 (0x256), region = 44 }
   0xc   : > { %v627_v0 = vld [vmem:[%s789_s1 + $0x8] sm:$0xff]  ;;  %s800_s21 = smov (!%p322_p4, %s676_s21), 1  ;;  %v626_v1 = vld [vmem:[%s789_s1] sm:$0xff]  ;;  %vm359_vm0 = vcmask 261120   ;;  %v686_v4 = vmov 0.0   ;;  %v687_v16 = vmov 32.0  }
   0xd   : > { %420 = vmatpush.bf16.msra.mxu0 %v627_v0  ;;  %s623_s29 = sshll.u32 %s800_s21, 4  ;;  %360 = vst.msk [vmem:[#allocation2] sm:$0xff] %vm359_vm0, %v686_v4  ;;  %s602_s9 = sshll.u32 %s800_s21, 3  ;;  %v655_v9 = vld [vmem:[%s790_s2] ss:$0 sm:$0xff]  ;;  %658 = vrcp.f32 %v687_v16 }
   0xe   : > { %s332_s8 = scalar_lea.vmem %s788_s0, %s623_s29  ;;  %s346_s12 = scalar_lea.vmem %s791_s3, %s602_s9  ;;  %v656_v37 = vld [vmem:[%s792_s4] ss:$0 sm:$0xff] }
   0xf   : > { %v624_v2 = vld [vmem:[%s332_s8] sm:$0xff]  ;;  %v625_v3 = vld [vmem:[%s332_s8 + $0x8] sm:$0xff]  ;;  %s353_s25 = scalar_lea.vmem %s794_s6, %s602_s9 }
  0x10   : > { %382 = vxpose.xlu0.c.b16.start [1/2] (short) (narrow) %v624_v2, 16  ;;  %v438_v12 = vld [vmem:[%s346_s12] sm:$0xff] }
  0x11   : > { %421 = vmatpush.bf16.msra.mxu0 %v626_v1  ;;  %v657_v39 = vld [vmem:[%s793_s5] ss:$0 sm:$0xff] }
  0x13   : > { %v659_v17 = vpop.eup %658 }
  0x14   : > { %v361_v6 = vld [vmem:[#allocation2] sm:$0xff]  ;;  %v444_v18 = vmul.f32 32.0, %v659_v17  ;;  %vm448_vm1 = vweird.f32 %v659_v17 }
  0x16   : > { %v445_v19 = vsub.f32 1.0, %v444_v18 }
  0x18   : > { %v446_v20 = vmul.f32 %v659_v17, %v445_v19 }
  0x1a   : > { %v447_v21 = vadd.f32 %v659_v17, %v446_v20 }
  0x1c   : > { %v449_v22 = vsel %vm448_vm1, %v659_v17, %v447_v21 }
  0x20   : > { %383 = vxpose.xlu0.c.b16.end [2/2] (short) (narrow) %v625_v3, 16 }
  0xbc   : > { %v390_v5 = vpop.trf.xlu0 }
  0xbd   : > { %620 = vmatmul.msk.bf16.vlgmr.msra.gmra.mxu0 %vm359_vm0, %v390_v5 }
 0x13a   : > { %v423_v7 = vpop.f32.mrf.mxu0 }
 0x13b   : > { %v427_v8 = vadd.f32 %v423_v7, %v361_v6 }
 0x13d   : > { %428 = vst.msk [vmem:[#allocation2] sm:$0xff] %vm359_vm0, %v427_v8 }
 0x142   : > { %v425_v10 = vpop.f32.mrf.mxu0 }
 0x144   : > { %v432_v11 = vld [vmem:[#allocation2] sm:$0xff] }
 0x145   : > { %v437_v13 = vadd.f32 %v655_v9, %v432_v11 }
 0x147   : > { %v439_v14 = vadd.f32 %v438_v12, %v437_v13 }
 0x149   : > { %v440_v15 = vsel %vm359_vm0, %v439_v14, 0.0 }
 0x14a   : > { %441 = vadd.xlane.f32.xlu1 %v440_v15 }
 0x1bd   : > { %v442_v23 = vpop.xlane.xlu1 %441 }
 0x1be   : > { %v450_v24 = vmul.f32 %v449_v22, %v442_v23 }
 0x1c0   : > { %v451_v25 = vsub.f32 %v439_v14, %v450_v24 }
 0x1c2   : > { %v452_v26 = vmul.f32 %v451_v25, %v451_v25 }
 0x1c4   : > { %v453_v27 = vsel %vm359_vm0, %v452_v26, 0.0 }
 0x1c5   : > { %454 = vadd.xlane.f32.xlu1 %v453_v27 }
 0x238   : > { %v455_v28 = vpop.xlane.xlu1 %454 }
 0x239   : > { %v456_v29 = vmul.f32 %v455_v28, %v449_v22 }
 0x23b   : > { %v457_v30 = vadd.f32 1e-07, %v456_v29 }
 0x23d   : > { %660 = vrsqrt.f32 %v457_v30  ;;  %vm464_vm3 = vweird.f32 %v457_v30 }
 0x243   : > { %v661_v31 = vpop.eup %660 }
 0x244   : > { %v459_v32 = vmul.f32 %v661_v31, %v457_v30  ;;  %vm465_vm2 = vweird.f32 %v661_v31 }
 0x245   : > { %vm466_vm4 = vmor %vm464_vm3, %vm465_vm2 }
 0x246   : > { %v460_v33 = vmul.f32 %v661_v31, %v459_v32 }
 0x248   : > { %v461_v34 = vmul.f32 0.5, %v460_v33 }
 0x24a   : > { %v462_v35 = vsub.f32 1.5, %v461_v34 }
 0x24c   : > { %v463_v36 = vmul.f32 %v661_v31, %v462_v35 }
 0x24e   : > { %v467_v38 = vsel %vm466_vm4, %v661_v31, %v463_v36 }
 0x24f   : > { %v468_v40 = vmul.f32 %v467_v38, %v451_v25 }
 0x251   : > { %v473_v41 = vmul.f32 %v656_v37, %v468_v40 }
 0x253   : > { %v478_v42 = vadd.f32 %v657_v39, %v473_v41 }
 0x255   : > { %479 = vst.msk [vmem:[%s353_s25] sm:$0xff] %vm359_vm0, %v478_v42 }
 0x256 PF: > { %s16_s23 = sadd.s32 1, %s684_s23   ;;  %s795_s21 = smov %s680_s22 }
 0x257   : > { %p13_p5 = scmp.ge.s32.totalorder %s16_s23, 4   ;;  %s796_s22 = smov %s798_s24 }
 0x259   :  { %15 = sbr.rel (!%p13_p5) target bundleno = 2 (0x2), region = 88 }

// kernel: run.19
= control target key start
LH: loop header
LB: loop body
LE: loop exit
PB: predicated region body
PF: predicated region fallthrough
CT: control target
= control target key end

     0   :  { %vm19_vm0 = vcmask 523264   ;;  %v130_v1 = vmov 0.0   ;;  %vm47_vm1 = vcmask 261120   ;;  %vm101_vm2 = vcmask 519168   ;;  %s173_s1 = inlined_call_operand.vmem [shape: bf16[32,64], index: 1, kind: input, shape index: {}]   ;;  %s174_s2 = inlined_call_operand.vmem [shape: f32[1,64], index: 2, kind: input, shape index: {}]   ;;  %s175_s0 = inlined_call_operand.vmem [shape: bf16[16,32], index: 0, kind: input, shape index: {}]   ;;  %s176_s3 = inlined_call_operand.vmem [shape: bf16[16,64], index: 3, kind: output, shape index: {}]  }
   0x1   :  { %v123_v0 = vld [vmem:[%s173_s1 + $0x8] sm:$0xff]  ;;  %20 = vst.msk [vmem:[#allocation2] sm:$0xff] %vm19_vm0, %v130_v1  ;;  %v122_v2 = vld [vmem:[%s173_s1] sm:$0xff] }
   0x2   :  { %21 = vst.msk [vmem:[#allocation2 + $0x8] sm:$0xff] %vm19_vm0, %v130_v1  ;;  %57 = vmatpush.bf16.msra.mxu0 %v123_v0  ;;  %v121_v3 = vld [vmem:[%s175_s0] sm:$0xff] }
   0x3   :  { %v125_v8 = vld [vmem:[%s174_s2] ss:$0 sm:$0xff] }
   0x6   :  { %58 = vmatpush.bf16.msra.mxu0 %v122_v2 }
   0x8   :  { %v22_v4 = vld [vmem:[#allocation2] sm:$0xff] }
   0x9   :  { %120 = vmatmul.msk.bf16.vlgmr.msra.gmra.mxu0 %vm47_vm1, %v121_v3  ;;  %v23_v7 = vld [vmem:[#allocation2 + $0x8] sm:$0xff] }
  0x86   :  { %v60_v5 = vpop.f32.mrf.mxu0 }
  0x87   :  { %v65_v6 = vadd.f32 %v60_v5, %v22_v4 }
  0x89   :  { %68 = vst.msk [vmem:[#allocation2] sm:$0xff] %vm19_vm0, %v65_v6 }
  0x8e   :  { %v62_v9 = vpop.f32.mrf.mxu0 }
  0x8f   :  { %v66_v10 = vadd.f32 %v62_v9, %v23_v7 }
  0x90   :  { %v73_v11 = vld [vmem:[#allocation2] sm:$0xff] }
  0x91   :  { %v79_v12 = vadd.f32 %v125_v8, %v73_v11  ;;  %69 = vst.msk [vmem:[#allocation2 + $0x8] sm:$0xff] %vm19_vm0, %v66_v10 }
  0x93   :  { %v83_v13 = vmul.f32 0.044715, %v79_v12  ;;  %v81_v26 = vmul.f32 0.5, %v79_v12 }
  0x95   :  { %v85_v14 = vmul.f32 %v83_v13, %v79_v12 }
  0x97   :  { %v87_v15 = vmul.f32 %v85_v14, %v79_v12 }
  0x98   :  { %v74_v16 = vld [vmem:[#allocation2 + $0x8] sm:$0xff] }
  0x99   :  { %v89_v17 = vadd.f32 %v87_v15, %v79_v12  ;;  %v80_v18 = vadd.f32 %v125_v8, %v74_v16 }
  0x9b   :  { %v91_v19 = vmul.f32 0.7978846, %v89_v17  ;;  %v84_v20 = vmul.f32 0.044715, %v80_v18  ;;  %v82_v31 = vmul.f32 0.5, %v80_v18 }
  0x9d   :  { %126 = vtanh.f32 %v91_v19  ;;  %v86_v21 = vmul.f32 %v84_v20, %v80_v18 }
  0x9f   :  { %v88_v22 = vmul.f32 %v86_v21, %v80_v18 }
  0xa1   :  { %v90_v23 = vadd.f32 %v88_v22, %v80_v18 }
  0xa3   :  { %v127_v24 = vpop.eup %126  ;;  %v92_v25 = vmul.f32 0.7978846, %v90_v23 }
  0xa4   :  { %v95_v27 = vadd.f32 1.0, %v127_v24 }
  0xa5   :  { %128 = vtanh.f32 %v92_v25 }
  0xa6   :  { %v97_v28 = vmul.f32 %v95_v27, %v81_v26 }
  0xa8   :  { %v99_v29 = vpack.c.bf16 %v97_v28, %v97_v28 }
  0xaa   :  { %102 = vst.msk [vmem:[%s176_s3] sm:$0xf] %vm101_vm2, %v99_v29 }
  0xab   :  { %v129_v30 = vpop.eup %128 }
  0xac   :  { %v96_v32 = vadd.f32 1.0, %v129_v30 }
  0xae   :  { %v98_v33 = vmul.f32 %v96_v32, %v82_v31 }
  0xb0   :  { %v100_v34 = vpack.c.bf16 %v98_v33, %v98_v33 }
  0xb2   :  { %103 = vst.msk [vmem:[%s176_s3 + $0x4] sm:$0xf] %vm101_vm2, %v100_v34 }

// kernel: run.20
= control target key start
LH: loop header
LB: loop body
LE: loop exit
PB: predicated region body
PF: predicated region fallthrough
CT: control target
= control target key end

     0   :  { %vm28_vm0 = vcmask 261120   ;;  %v216_v1 = vmov 0.0   ;;  %vm72_vm1 = vcmask 523264   ;;  %v217_v23 = vmov 32.0   ;;  %s299_s1 = inlined_call_operand.vmem [shape: bf16[64,32], index: 1, kind: input, shape index: {}]   ;;  %s300_s0 = inlined_call_operand.vmem [shape: bf16[16,64], index: 0, kind: input, shape index: {}]   ;;  %s301_s2 = inlined_call_operand.vmem [shape: f32[1,32], index: 2, kind: input, shape index: {}]   ;;  %s302_s3 = inlined_call_operand.vmem [shape: f32[16,32], index: 3, kind: input, shape index: {}]   ;;  %s303_s4 = inlined_call_operand.vmem [shape: f32[1,32], index: 4, kind: input, shape index: {}]   ;;  %s304_s5 = inlined_call_operand.vmem [shape: f32[1,32], index: 5, kind: input, shape index: {}]   ;;  %s305_s6 = inlined_call_operand.vmem [shape: f32[16,32], index: 6, kind: output, shape index: {}]  }
   0x1   :  { %v204_v0 = vld [vmem:[%s299_s1 + $0x18] sm:$0xff]  ;;  %29 = vst.msk [vmem:[#allocation2] sm:$0xff] %vm28_vm0, %v216_v1  ;;  %v203_v2 = vld [vmem:[%s299_s1 + $0x10] sm:$0xff]  ;;  %v202_v3 = vld [vmem:[%s299_s1 + $0x8] sm:$0xff]  ;;  %210 = vrcp.f32 %v217_v23 }
   0x2   :  { %30 = vst.msk [vmem:[#allocation2 + $0x8] sm:$0xff] %vm28_vm0, %v216_v1  ;;  %80 = vmatpush.bf16.msra.mxu0 %v204_v0  ;;  %v201_v4 = vld [vmem:[%s299_s1] sm:$0xff]  ;;  %v107_v19 = vld [vmem:[%s302_s3 + $0x8] sm:$0xff] }
   0x3   :  { %v200_v5 = vld [vmem:[%s300_s0] sm:$0xff] }
   0x4   :  { %v207_v10 = vld [vmem:[%s301_s2] ss:$0 sm:$0xff] }
   0x5   :  { %v106_v14 = vld [vmem:[%s302_s3] sm:$0xff] }
   0x6   :  { %81 = vmatpush.bf16.msra.mxu0 %v203_v2  ;;  %v208_v54 = vld [vmem:[%s303_s4] ss:$0 sm:$0xff] }
   0x7   :  { %v211_v24 = vpop.eup %210  ;;  %v209_v57 = vld [vmem:[%s304_s5] ss:$0 sm:$0xff] }
   0x8   :  { %v31_v6 = vld [vmem:[#allocation2] sm:$0xff]  ;;  %v117_v25 = vmul.f32 32.0, %v211_v24  ;;  %vm121_vm2 = vweird.f32 %v211_v24 }
   0x9   :  { %v32_v9 = vld [vmem:[#allocation2 + $0x8] sm:$0xff] }
   0xa   :  { %82 = vmatpush.bf16.msra.mxu0 %v202_v3  ;;  %v118_v26 = vsub.f32 1.0, %v117_v25 }
   0xc   :  { %v119_v27 = vmul.f32 %v211_v24, %v118_v26 }
   0xe   :  { %83 = vmatpush.bf16.msra.mxu0 %v201_v4  ;;  %v120_v28 = vadd.f32 %v211_v24, %v119_v27 }
  0x10   :  { %v122_v29 = vsel %vm121_vm2, %v211_v24, %v120_v28 }
  0x11   :  { %199 = vmatmul.msk.bf16.vlgmr.msra.gmra.mxu0 %vm72_vm1, %v200_v5 }
  0x8e   :  { %v85_v7 = vpop.f32.mrf.mxu0 }
  0x8f   :  { %v90_v8 = vadd.f32 %v85_v7, %v31_v6 }
  0x91   :  { %93 = vst.msk [vmem:[#allocation2] sm:$0xff] %vm28_vm0, %v90_v8 }
  0x96   :  { %v87_v11 = vpop.f32.mrf.mxu0 }
  0x97   :  { %v91_v12 = vadd.f32 %v87_v11, %v32_v9 }
  0x98   :  { %v98_v13 = vld [vmem:[#allocation2] sm:$0xff] }
  0x99   :  { %94 = vst.msk [vmem:[#allocation2 + $0x8] sm:$0xff] %vm28_vm0, %v91_v12  ;;  %v104_v15 = vadd.f32 %v207_v10, %v98_v13 }
  0x9b   :  { %v108_v16 = vadd.f32 %v106_v14, %v104_v15 }
  0x9d   :  { %v110_v17 = vsel %vm28_vm0, %v108_v16, 0.0 }
  0x9e   :  { %111 = vadd.xlane.f32.xlu0 %v110_v17 }
  0xa0   :  { %v99_v18 = vld [vmem:[#allocation2 + $0x8] sm:$0xff] }
  0xa1   :  { %v105_v20 = vadd.f32 %v207_v10, %v99_v18 }
  0xa3   :  { %v109_v21 = vadd.f32 %v107_v19, %v105_v20 }
  0xa5   :  { %v113_v22 = vsel %vm28_vm0, %v109_v21, 0.0 }
  0xa6   :  { %114 = vadd.xlane.f32.xlu0 %v113_v22 }
 0x111   :  { %v112_v30 = vpop.xlane.xlu0 %111 }
 0x112   :  { %v123_v31 = vmul.f32 %v122_v29, %v112_v30 }
 0x114   :  { %v125_v32 = vsub.f32 %v108_v16, %v123_v31 }
 0x116   :  { %v127_v33 = vmul.f32 %v125_v32, %v125_v32 }
 0x118   :  { %v129_v34 = vsel %vm28_vm0, %v127_v33, 0.0 }
 0x119   :  { %130 = vadd.xlane.f32.xlu1 %v129_v34  ;;  %v115_v35 = vpop.xlane.xlu0 %114 }
 0x11a   :  { %v124_v36 = vmul.f32 %v122_v29, %v115_v35 }
 0x11c   :  { %v126_v37 = vsub.f32 %v109_v21, %v124_v36 }
 0x11e   :  { %v128_v38 = vmul.f32 %v126_v37, %v126_v37 }
 0x120   :  { %v132_v39 = vsel %vm28_vm0, %v128_v38, 0.0 }
 0x121   :  { %133 = vadd.xlane.f32.xlu1 %v132_v39 }
 0x18c   :  { %v131_v40 = vpop.xlane.xlu1 %130 }
 0x18d   :  { %v135_v41 = vmul.f32 %v131_v40, %v122_v29 }
 0x18f   :  { %v137_v42 = vadd.f32 1e-07, %v135_v41 }
 0x191   :  { %212 = vrsqrt.f32 %v137_v42  ;;  %vm145_vm4 = vweird.f32 %v137_v42 }
 0x194   :  { %v134_v43 = vpop.xlane.xlu1 %133 }
 0x195   :  { %v136_v44 = vmul.f32 %v134_v43, %v122_v29 }
 0x197   :  { %v213_v45 = vpop.eup %212  ;;  %v138_v46 = vadd.f32 1e-07, %v136_v44 }
 0x198   :  { %v140_v47 = vmul.f32 %v213_v45, %v137_v42  ;;  %vm146_vm3 = vweird.f32 %v213_v45 }
 0x199   :  { %214 = vrsqrt.f32 %v138_v46  ;;  %vm147_vm5 = vmor %vm145_vm4, %vm146_vm3  ;;  %vm155_vm7 = vweird.f32 %v138_v46 }
 0x19a   :  { %v141_v48 = vmul.f32 %v213_v45, %v140_v47 }
 0x19c   :  { %v142_v49 = vmul.f32 0.5, %v141_v48 }
 0x19e   :  { %v143_v50 = vsub.f32 1.5, %v142_v49 }
 0x19f   :  { %v215_v51 = vpop.eup %214 }
 0x1a0   :  { %v144_v52 = vmul.f32 %v213_v45, %v143_v50  ;;  %v150_v53 = vmul.f32 %v215_v51, %v138_v46  ;;  %vm156_vm6 = vweird.f32 %v215_v51 }
 0x1a1   :  { %vm157_vm8 = vmor %vm155_vm7, %vm156_vm6 }
 0x1a2   :  { %v148_v55 = vsel %vm147_vm5, %v213_v45, %v144_v52  ;;  %v151_v56 = vmul.f32 %v215_v51, %v150_v53 }
 0x1a3   :  { %v159_v58 = vmul.f32 %v148_v55, %v125_v32 }
 0x1a4   :  { %v152_v59 = vmul.f32 0.5, %v151_v56 }
 0x1a5   :  { %v165_v60 = vmul.f32 %v208_v54, %v159_v58 }
 0x1a6   :  { %v153_v61 = vsub.f32 1.5, %v152_v59 }
 0x1a7   :  { %v171_v62 = vadd.f32 %v209_v57, %v165_v60 }
 0x1a8   :  { %v154_v63 = vmul.f32 %v215_v51, %v153_v61 }
 0x1a9   :  { %173 = vst.msk [vmem:[%s305_s6] sm:$0xff] %vm28_vm0, %v171_v62 }
 0x1aa   :  { %v158_v0 = vsel %vm157_vm8, %v215_v51, %v154_v63 }
 0x1ab   :  { %v160_v1 = vmul.f32 %v158_v0, %v126_v37 }
 0x1ad   :  { %v166_v2 = vmul.f32 %v208_v54, %v160_v1 }
 0x1af   :  { %v172_v3 = vadd.f32 %v209_v57, %v166_v2 }
 0x1b1   :  { %174 = vst.msk [vmem:[%s305_s6 + $0x8] sm:$0xff] %vm28_vm0, %v172_v3 }

// kernel: run.27
= control target key start
LH: loop header
LB: loop body
LE: loop exit
PB: predicated region body
PF: predicated region fallthrough
CT: control target
= control target key end

     0   :  { %vm32_vm0 = vcmask 261120   ;;  %v269_v1 = vmov 0.0   ;;  %s363_s0 = inlined_call_operand.vmem [shape: bf16[16,64], index: 0, kind: input, shape index: {}]   ;;  %s364_s1 = inlined_call_operand.vmem [shape: bf16[64,32], index: 1, kind: input, shape index: {}]   ;;  %s365_s2 = inlined_call_operand.vmem [shape: f32[1,32], index: 2, kind: input, shape index: {}]   ;;  %s366_s3 = inlined_call_operand.vmem [shape: f32[16,32], index: 3, kind: input, shape index: {}]   ;;  %s367_s4 = inlined_call_operand.vmem [shape: f32[1,32], index: 4, kind: input, shape index: {}]   ;;  %s368_s5 = inlined_call_operand.vmem [shape: f32[1,32], index: 5, kind: input, shape index: {}]   ;;  %s369_s6 = inlined_call_operand.vmem [shape: f32[16,32], index: 6, kind: input, shape index: {}]   ;;  %s370_s7 = inlined_call_operand.hbm [shape: f32[16,32], index: 7, kind: output, shape index: {}]  }
   0x1   :  { %v228_v0 = vld [vmem:[%s364_s1 + $0x18] sm:$0xff]  ;;  %33 = vst.msk [vmem:[#allocation2] sm:$0xff] %vm32_vm0, %v269_v1  ;;  %v227_v2 = vld [vmem:[%s364_s1 + $0x10] sm:$0xff] }
   0x2   :  { %84 = vmatpush.bf16.msra.mxu0 %v228_v0  ;;  %34 = vst.msk [vmem:[#allocation2 + $0x8] sm:$0xff] %vm32_vm0, %v269_v1 }
   0x3   :  { %12 = vsyncpa [#allocation4], 0  ;;  %v226_v3 = vld [vmem:[%s364_s1 + $0x8] sm:$0xff]  ;;  %v225_v4 = vld [vmem:[%s364_s1] sm:$0xff]  ;;  %vm76_vm1 = vcmask 523264   ;;  %v270_v23 = vmov 32.0  }
   0x4   :  { %v224_v5 = vld [vmem:[%s363_s0] sm:$0xff]  ;;  %v111_v19 = vld [vmem:[%s366_s3 + $0x8] sm:$0xff]  ;;  %237 = vrcp.f32 %v270_v23  ;;  %s271_s19 = smov [#allocation3]   ;;  %s191_s23 = sshll.u32 %s370_s7, 4  ;;  %s192_s23 = int_to_ptr.hbm [resolvable:$true] %s191_s23 }
   0x5   :  { %v234_v10 = vld [vmem:[%s365_s2] ss:$0 sm:$0xff]  ;;  %s189_s20 = sshll.u32 %s271_s19, 4  ;;  %s272_s24 = smov 128   ;;  %s190_s20 = int_to_ptr.vmem [resolvable:$true] %s189_s20 }
   0x6   :  { %85 = vmatpush.bf16.msra.mxu0 %v227_v2  ;;  %v110_v14 = vld [vmem:[%s366_s3] sm:$0xff]  ;;  %s273_s25 = smov 8  }
   0x7   :  { %v235_v54 = vld [vmem:[%s367_s4] ss:$0 sm:$0xff] }
   0x8   :  { %v35_v6 = vld [vmem:[#allocation2] sm:$0xff] }
   0x9   :  { %v36_v9 = vld [vmem:[#allocation2 + $0x8] sm:$0xff]  ;;  %v236_v57 = vld [vmem:[%s368_s5] ss:$0 sm:$0xff] }
   0xa   :  { %86 = vmatpush.bf16.msra.mxu0 %v226_v3  ;;  %v238_v24 = vpop.eup %237  ;;  %v177_v62 = vld [vmem:[%s369_s6] sm:$0xff] }
   0xb   :  { %v121_v25 = vmul.f32 32.0, %v238_v24  ;;  %vm125_vm2 = vweird.f32 %v238_v24 }
   0xd   :  { %v122_v26 = vsub.f32 1.0, %v121_v25 }
   0xe   :  { %87 = vmatpush.bf16.msra.mxu0 %v225_v4 }
   0xf   :  { %v123_v27 = vmul.f32 %v238_v24, %v122_v26 }
  0x11   :  { %223 = vmatmul.msk.bf16.vlgmr.msra.gmra.mxu0 %vm76_vm1, %v224_v5  ;;  %v124_v28 = vadd.f32 %v238_v24, %v123_v27 }
  0x13   :  { %v126_v29 = vsel %vm125_vm2, %v238_v24, %v124_v28 }
  0x8e   :  { %v89_v7 = vpop.f32.mrf.mxu0 }
  0x8f   :  { %v94_v8 = vadd.f32 %v89_v7, %v35_v6  ;;  %v178_v6 = vld [vmem:[%s369_s6 + $0x8] sm:$0xff] }
  0x91   :  { %97 = vst.msk [vmem:[#allocation2] sm:$0xff] %vm32_vm0, %v94_v8 }
  0x96   :  { %v91_v11 = vpop.f32.mrf.mxu0 }
  0x97   :  { %v95_v12 = vadd.f32 %v91_v11, %v36_v9 }
  0x98   :  { %v102_v13 = vld [vmem:[#allocation2] sm:$0xff] }
  0x99   :  { %98 = vst.msk [vmem:[#allocation2 + $0x8] sm:$0xff] %vm32_vm0, %v95_v12  ;;  %v108_v15 = vadd.f32 %v234_v10, %v102_v13 }
  0x9b   :  { %v112_v16 = vadd.f32 %v110_v14, %v108_v15 }
  0x9d   :  { %v114_v17 = vsel %vm32_vm0, %v112_v16, 0.0 }
  0x9e   :  { %115 = vadd.xlane.f32.xlu0 %v114_v17 }
  0xa0   :  { %v103_v18 = vld [vmem:[#allocation2 + $0x8] sm:$0xff] }
  0xa1   :  { %v109_v20 = vadd.f32 %v234_v10, %v103_v18 }
  0xa3   :  { %v113_v21 = vadd.f32 %v111_v19, %v109_v20 }
  0xa5   :  { %v117_v22 = vsel %vm32_vm0, %v113_v21, 0.0 }
  0xa6   :  { %118 = vadd.xlane.f32.xlu0 %v117_v22 }
 0x111   :  { %v116_v30 = vpop.xlane.xlu0 %115 }
 0x112   :  { %v127_v31 = vmul.f32 %v126_v29, %v116_v30 }
 0x114   :  { %v129_v32 = vsub.f32 %v112_v16, %v127_v31 }
 0x116   :  { %v131_v33 = vmul.f32 %v129_v32, %v129_v32 }
 0x118   :  { %v133_v34 = vsel %vm32_vm0, %v131_v33, 0.0 }
 0x119   :  { %134 = vadd.xlane.f32.xlu1 %v133_v34  ;;  %v119_v35 = vpop.xlane.xlu0 %118 }
 0x11a   :  { %v128_v36 = vmul.f32 %v126_v29, %v119_v35 }
 0x11c   :  { %v130_v37 = vsub.f32 %v113_v21, %v128_v36 }
 0x11e   :  { %v132_v38 = vmul.f32 %v130_v37, %v130_v37 }
 0x120   :  { %v136_v39 = vsel %vm32_vm0, %v132_v38, 0.0 }
 0x121   :  { %137 = vadd.xlane.f32.xlu1 %v136_v39 }
 0x18c   :  { %v135_v40 = vpop.xlane.xlu1 %134 }
 0x18d   :  { %v139_v41 = vmul.f32 %v135_v40, %v126_v29 }
 0x18f   :  { %v141_v42 = vadd.f32 1e-07, %v139_v41 }
 0x191   :  { %239 = vrsqrt.f32 %v141_v42  ;;  %vm149_vm4 = vweird.f32 %v141_v42 }
 0x194   :  { %v138_v43 = vpop.xlane.xlu1 %137 }
 0x195   :  { %v140_v44 = vmul.f32 %v138_v43, %v126_v29 }
 0x197   :  { %v240_v45 = vpop.eup %239  ;;  %v142_v46 = vadd.f32 1e-07, %v140_v44 }
 0x198   :  { %v144_v47 = vmul.f32 %v240_v45, %v141_v42  ;;  %vm150_vm3 = vweird.f32 %v240_v45 }
 0x199   :  { %241 = vrsqrt.f32 %v142_v46  ;;  %vm151_vm5 = vmor %vm149_vm4, %vm150_vm3  ;;  %vm159_vm7 = vweird.f32 %v142_v46 }
 0x19a   :  { %v145_v48 = vmul.f32 %v240_v45, %v144_v47 }
 0x19c   :  { %v146_v49 = vmul.f32 0.5, %v145_v48 }
 0x19e   :  { %v147_v50 = vsub.f32 1.5, %v146_v49 }
 0x19f   :  { %v242_v51 = vpop.eup %241 }
 0x1a0   :  { %v148_v52 = vmul.f32 %v240_v45, %v147_v50  ;;  %v154_v53 = vmul.f32 %v242_v51, %v142_v46  ;;  %vm160_vm6 = vweird.f32 %v242_v51 }
 0x1a1   :  { %vm161_vm8 = vmor %vm159_vm7, %vm160_vm6 }
 0x1a2   :  { %v152_v55 = vsel %vm151_vm5, %v240_v45, %v148_v52  ;;  %v155_v56 = vmul.f32 %v242_v51, %v154_v53 }
 0x1a3   :  { %v163_v58 = vmul.f32 %v152_v55, %v129_v32 }
 0x1a4   :  { %v156_v59 = vmul.f32 0.5, %v155_v56 }
 0x1a5   :  { %v169_v60 = vmul.f32 %v235_v54, %v163_v58 }
 0x1a6   :  { %v157_v61 = vsub.f32 1.5, %v156_v59 }
 0x1a7   :  { %v175_v63 = vadd.f32 %v236_v57, %v169_v60 }
 0x1a8   :  { %v158_v0 = vmul.f32 %v242_v51, %v157_v61 }
 0x1a9   :  { %v179_v1 = vadd.f32 %v177_v62, %v175_v63 }
 0x1aa   :  { %v162_v2 = vsel %vm161_vm8, %v242_v51, %v158_v0 }
 0x1ab   :  { %v164_v3 = vmul.f32 %v162_v2, %v130_v37  ;;  %v181_v4 = vmul.f32 0.5, %v179_v1 }
 0x1ad   :  { %v170_v5 = vmul.f32 %v235_v54, %v164_v3  ;;  %183 = vst.msk [vmem:[#allocation3] sm:$0xff] %vm32_vm0, %v181_v4 }
 0x1af   :  { %v176_v7 = vadd.f32 %v236_v57, %v170_v5 }
 0x1b1   :  { %v180_v8 = vadd.f32 %v178_v6, %v176_v7 }
 0x1b3   :  { %v182_v9 = vmul.f32 0.5, %v180_v8 }
 0x1b5   :  { %184 = vst.msk [vmem:[#allocation3 + $0x8] sm:$0xff] %vm32_vm0, %v182_v9 }
 0x1b6   :  { %197 = dma.vmem_to_hbm [thread:$0]  %s190_s20, 256, %s192_s23, [#allocation4], %s272_s24, %s272_s24, %s273_s25  }
 0x1b7   :  { %267 = dma.done.wait [#allocation4], 256  }
 0x1b8   :  { %268 = vsyncadd [#allocation4], 4294967040 }
 0x1b9   :  { %202 = vsyncpa [#allocation4], 1 }

</bundles_post_ra>
